<compile_context>
chip_gen: v6e
topology: v6e:2x2x1
jax: 0.10.0
libtpu: 0.0.40
codegen_flags: <defaults>
</compile_context>

<pallas_src>
import math

import jax
import jax.numpy as jnp
from jax.experimental import pallas as pl
from jax.experimental.pallas import tpu as pltpu

# ---------------- problem sizes (small, consistent with the module) ----------
B = 2         # batch
S = 8         # seq_len
D = 32        # d_model
H = 4         # num heads
DH = D // H   # head dim
F = 64        # feed-forward hidden dim
EPS = 1e-6
BS = B * S    # batch stacked on sublanes -> (B*S, D) operands

LANE = 128    # lane-aligned slot width for packed parameter buffers

# Column offsets (lane-aligned slots) in the packed weight buffer wa: (D, 6*LANE)
_W_SELF_QKV = 0 * LANE   # (D, 3D)  (Q columns pre-scaled by 1/sqrt(DH))
_W_SELF_O   = 1 * LANE   # (D, D)
_W_SRC_Q    = 2 * LANE   # (D, D)   (pre-scaled by 1/sqrt(DH))
_W_SRC_KV   = 3 * LANE   # (D, 2D)
_W_SRC_O    = 4 * LANE   # (D, D)
_W_FF1      = 5 * LANE   # (D, F)

# Row offsets in the packed bias+w2 buffer wb: (16 + F, LANE)
_B_SELF_QKV = 0
_B_SELF_O   = 1
_B_SRC_Q    = 2
_B_SRC_KV   = 3
_B_SRC_O    = 4
_B_LN_G     = 5    # rows 5, 6, 7
_B_LN_B     = 8    # rows 8, 9, 10
_B_FF1      = 11
_B_FF2      = 12
_W_FF2_ROW  = 16   # sublane-aligned start of the (F, D) second FFN weight


# ---------------- Pallas kernel ----------------------------------------------
def decoder_layer_kernel(xm_ref, mask_ref, wa_ref, wb_ref, o_ref):
    neg_inf = jnp.float32(-1e9)

    # ---- packed parameters: static, lane-offset-0 slices, loaded once -------
    w_self_qkv = wa_ref[:, _W_SELF_QKV:_W_SELF_QKV + 3 * D]   # (D, 3D)
    w_self_o   = wa_ref[:, _W_SELF_O:_W_SELF_O + D]           # (D, D)
    w_src_q    = wa_ref[:, _W_SRC_Q:_W_SRC_Q + D]             # (D, D)
    w_src_kv   = wa_ref[:, _W_SRC_KV:_W_SRC_KV + 2 * D]       # (D, 2D)
    w_src_o    = wa_ref[:, _W_SRC_O:_W_SRC_O + D]             # (D, D)
    w_ff1      = wa_ref[:, _W_FF1:_W_FF1 + F]                 # (D, F)
    w_ff2      = wb_ref[_W_FF2_ROW:_W_FF2_ROW + F, 0:D]       # (F, D), sublane-aligned

    b_self_qkv = wb_ref[_B_SELF_QKV, 0:3 * D]
    b_self_o   = wb_ref[_B_SELF_O, 0:D]
    b_src_q    = wb_ref[_B_SRC_Q, 0:D]
    b_src_kv   = wb_ref[_B_SRC_KV, 0:2 * D]
    b_src_o    = wb_ref[_B_SRC_O, 0:D]
    ln_g = [wb_ref[_B_LN_G + i, 0:D] for i in range(3)]
    ln_b = [wb_ref[_B_LN_B + i, 0:D] for i in range(3)]
    b_ff1 = wb_ref[_B_FF1, 0:F]
    b_ff2 = wb_ref[_B_FF2, 0:D]

    def layernorm(v, g, b):
        # v: (BS, D). PyTorch x.std(-1) is the *unbiased* std (ddof = 1).
        mean = jnp.mean(v, axis=-1, keepdims=True)
        var = jnp.sum((v - mean) ** 2, axis=-1, keepdims=True) * (1.0 / (D - 1))
        inv = pl.reciprocal(jnp.sqrt(var) + EPS, approx=False)   # EUP, exact
        return g * (v - mean) * inv + b

    def attention(q_all, k_all, v_all, attn_idx, w_o, b_o):
        # q_all/k_all/v_all: (BS, D) with 1/sqrt(DH) already folded into Q.
        outs = []
        for b in range(B):
            r0 = b * S
            q_b = q_all[r0:r0 + S, :]          # (S, D) free sublane slice
            k_b = k_all[r0:r0 + S, :]
            v_b = v_all[r0:r0 + S, :]
            kT = k_b.T                         # one XLU transpose per (batch, attn)
            # Hoisted additive mask (mask == 0 -> -1e9), once per (batch, attn).
            add_mask = jnp.where(mask_ref[attn_idx * B + b] == 0.0, neg_inf, 0.0)
            out_b = None
            for h in range(H):                 # static unroll over heads
                c0, c1 = h * DH, (h + 1) * DH
                sc = jnp.dot(q_b[:, c0:c1], kT[c0:c1, :],
                             preferred_element_type=jnp.float32) + add_mask
                m = jnp.max(sc, axis=-1, keepdims=True)
                e = jnp.exp(sc - m)
                p = e * pl.reciprocal(jnp.sum(e, axis=-1, keepdims=True),
                                      approx=False)
                ctx = jnp.dot(p, v_b[:, c0:c1],
                              preferred_element_type=jnp.float32)       # (S, DH)
                # Accumulate directly into the output projection: w_o row slices
                # are sublane-aligned (free); no head concat, no ctx temporary.
                contrib = jnp.dot(ctx, w_o[c0:c1, :],
                                  preferred_element_type=jnp.float32)   # (S, D)
                out_b = contrib if out_b is None else out_b + contrib
            outs.append(out_b + b_o)
        return jnp.concatenate(outs, axis=0)   # (BS, D), 8-aligned sublane concat

    x = xm_ref[0]      # (BS, D)
    mem = xm_ref[1]    # (BS, D)

    # --- sublayer 0: self attention (fused QKV GEMM on the stacked batch) ----
    xn = layernorm(x, ln_g[0], ln_b[0])
    qkv = jnp.dot(xn, w_self_qkv, preferred_element_type=jnp.float32) + b_self_qkv
    x = x + attention(qkv[:, 0:D], qkv[:, D:2 * D], qkv[:, 2 * D:3 * D],
                      0, w_self_o, b_self_o)

    # --- sublayer 1: cross (src) attention (fused KV GEMM on memory) ---------
    xn = layernorm(x, ln_g[1], ln_b[1])
    q_all = jnp.dot(xn, w_src_q, preferred_element_type=jnp.float32) + b_src_q
    kv = jnp.dot(mem, w_src_kv, preferred_element_type=jnp.float32) + b_src_kv
    x = x + attention(q_all, kv[:, 0:D], kv[:, D:2 * D], 1, w_src_o, b_src_o)

    # --- sublayer 2: feed forward (single (BS, D) pass) -----------------------
    xn = layernorm(x, ln_g[2], ln_b[2])
    h1 = jnp.maximum(
        jnp.dot(xn, w_ff1, preferred_element_type=jnp.float32) + b_ff1, 0.0)
    x = x + jnp.dot(h1, w_ff2, preferred_element_type=jnp.float32) + b_ff2

    # TODO(synk): dropout (training mode) not implemented; eval-mode identity.
    o_ref[...] = x               # single (BS, D) store


# ---------------- parameter packing (one-time, at weight-load time) ----------
def pack_params(params):
    """Pack the 10 parameter arrays into 2 lane-aligned buffers.

    Runs ONCE at weight-load time (not per forward call).  1/sqrt(DH) is folded
    into the Q projection weights and biases so the kernel never multiplies the
    scores by the scale.
    """
    self_w, self_b, src_w, src_b, ln_g, ln_b, w1, b1, w2, b2 = params
    inv_sqrt_dh = 1.0 / math.sqrt(DH)

    def slot(w):  # pad a (D, n<=LANE) weight into a (D, LANE) lane-aligned slot
        return jnp.pad(w, ((0, 0), (0, LANE - w.shape[1])))

    wa = jnp.concatenate([
        slot(jnp.concatenate([self_w[0] * inv_sqrt_dh, self_w[1], self_w[2]],
                             axis=1)),                                 # fused QKV
        slot(self_w[3]),                                               # self out
        slot(src_w[0] * inv_sqrt_dh),                                  # src q
        slot(jnp.concatenate([src_w[1], src_w[2]], axis=1)),           # src kv
        slot(src_w[3]),                                                # src out
        slot(w1),                                                      # ffn w1
    ], axis=1).astype(jnp.float32)                                     # (D, 768)

    def row(v):
        v = jnp.asarray(v, jnp.float32).reshape(-1)
        return jnp.pad(v, (0, LANE - v.shape[0]))[None, :]

    bias_rows = jnp.concatenate([
        row(jnp.concatenate([self_b[0] * inv_sqrt_dh, self_b[1], self_b[2]])),
        row(self_b[3]),
        row(src_b[0] * inv_sqrt_dh),
        row(jnp.concatenate([src_b[1], src_b[2]])),
        row(src_b[3]),
        row(ln_g[0]), row(ln_g[1]), row(ln_g[2]),
        row(ln_b[0]), row(ln_b[1]), row(ln_b[2]),
        row(b1), row(b2),
        jnp.zeros((_W_FF2_ROW - 13, LANE), jnp.float32),               # pad to 16
    ], axis=0)                                                         # (16, 128)
    w2_pad = jnp.pad(w2.astype(jnp.float32), ((0, 0), (0, LANE - D)))  # (F, 128)
    wb = jnp.concatenate([bias_rows, w2_pad], axis=0)                  # (80, 128)
    return wa, wb


# ---------------- wrapper -----------------------------------------------------
@jax.jit
def decoder_layer(x, memory, tgt_mask, src_mask, packed):
    wa, wb = packed
    # 4 input DMAs total: activations (x+memory), masks, packed weights, biases+w2.
    xm = jnp.stack([x.reshape(BS, D), memory.reshape(BS, D)], axis=0)   # (2, BS, D)
    masks = jnp.concatenate([tgt_mask, src_mask], axis=0)              # (2B, S, S)
    vmem = lambda: pl.BlockSpec(memory_space=pltpu.MemorySpace.VMEM)
    out = pl.pallas_call(
        decoder_layer_kernel,
        out_shape=jax.ShapeDtypeStruct((BS, D), jnp.float32),
        in_specs=[vmem(), vmem(), vmem(), vmem()],
        out_specs=vmem(),
    )(xm, masks, wa, wb)
    return out.reshape(B, S, D)


# ---------------- pure-JAX reference (for verification) ----------------------
def reference(x, memory, tgt_mask, src_mask, params):
    (self_w, self_b, src_w, src_b, ln_g, ln_b, w1, b1, w2, b2) = params

    def layernorm(v, g, b):
        mean = jnp.mean(v, axis=-1, keepdims=True)
        std = jnp.sqrt(jnp.sum((v - mean) ** 2, axis=-1, keepdims=True) / (D - 1))
        return g * (v - mean) / (std + EPS) + b

    def mha(q_in, kv_in, mask, w, bias):
        q = q_in @ w[0] + bias[0]
        k = kv_in @ w[1] + bias[1]
        v = kv_in @ w[2] + bias[2]
        qh = q.reshape(B, S, H, DH)
        kh = k.reshape(B, S, H, DH)
        vh = v.reshape(B, S, H, DH)
        sc = jnp.einsum('bqhd,bkhd->bhqk', qh, kh) / math.sqrt(DH)
        sc = jnp.where(mask[:, None, :, :] == 0.0, -1e9, sc)
        p = jax.nn.softmax(sc, axis=-1)
        ctx = jnp.einsum('bhqk,bkhd->bqhd', p, vh).reshape(B, S, D)
        return ctx @ w[3] + bias[3]

    xn = layernorm(x, ln_g[0], ln_b[0])
    x = x + mha(xn, xn, tgt_mask, self_w, self_b)
    xn = layernorm(x, ln_g[1], ln_b[1])
    x = x + mha(xn, memory, src_mask, src_w, src_b)
    xn = layernorm(x, ln_g[2], ln_b[2])
    x = x + jnp.maximum(xn @ w1 + b1, 0.0) @ w2 + b2
    return x


# ---------------- main --------------------------------------------------------
if __name__ == "__main__":
    key = jax.random.PRNGKey(0)
    keys = jax.random.split(key, 10)

    x = jax.random.normal(keys[0], (B, S, D), jnp.float32)
    memory = jax.random.normal(keys[1], (B, S, D), jnp.float32)

    # tgt_mask: causal; src_mask: all ones (both remain runtime inputs)
    tgt_mask = jnp.broadcast_to(
        jnp.tril(jnp.ones((S, S), jnp.float32)), (B, S, S))
    src_mask = jnp.ones((B, S, S), jnp.float32)

    scale = 0.1
    self_w = scale * jax.random.normal(keys[2], (4, D, D), jnp.float32)
    self_b = scale * jax.random.normal(keys[3], (4, D), jnp.float32)
    src_w = scale * jax.random.normal(keys[4], (4, D, D), jnp.float32)
    src_b = scale * jax.random.normal(keys[5], (4, D), jnp.float32)
    ln_g = jnp.ones((3, D), jnp.float32)
    ln_b = jnp.zeros((3, D), jnp.float32)
    w1 = scale * jax.random.normal(keys[6], (D, F), jnp.float32)
    b1 = scale * jax.random.normal(keys[7], (1, F), jnp.float32)
    w2 = scale * jax.random.normal(keys[8], (F, D), jnp.float32)
    b2 = scale * jax.random.normal(keys[9], (1, D), jnp.float32)

    params = (self_w, self_b, src_w, src_b, ln_g, ln_b, w1, b1, w2, b2)

    # One-time packing (weight-load time), hoisted out of the per-call path.
    packed = jax.tree_util.tree_map(jax.block_until_ready, pack_params(params))

    out = decoder_layer(x, memory, tgt_mask, src_mask, packed)
    out = jax.block_until_ready(out)

    ref = reference(x, memory, tgt_mask, src_mask, params)
    assert out.shape == (B, S, D)
    assert jnp.allclose(out, ref, atol=1e-4, rtol=1e-4)

    print("KERNEL_OK")
</pallas_src>

<mosaic_0001>
module attributes {stable_mosaic.version = 11 : i64} {
  func.func @decoder_layer_kernel(%arg0: memref<2x16x32xf32, #tpu.memory_space<vmem>>, %arg1: memref<4x8x8xf32, #tpu.memory_space<vmem>>, %arg2: memref<32x768xf32, #tpu.memory_space<vmem>>, %arg3: memref<80x128xf32, #tpu.memory_space<vmem>>, %arg4: memref<16x32xf32, #tpu.memory_space<vmem>>) attributes {dimension_semantics = [], scalar_prefetch = 0 : i64, scratch_operands = 0 : i64, tpu.core_type = #tpu.core_type<tc>} {
    %c0 = arith.constant 0 : index
    %c0_0 = arith.constant 0 : index
    %0 = vector.load %arg2[%c0, %c0_0] : memref<32x768xf32, #tpu.memory_space<vmem>>, vector<32x96xf32>
    %c0_1 = arith.constant 0 : index
    %c128 = arith.constant 128 : index
    %1 = vector.load %arg2[%c0_1, %c128] : memref<32x768xf32, #tpu.memory_space<vmem>>, vector<32x32xf32>
    %c0_2 = arith.constant 0 : index
    %c256 = arith.constant 256 : index
    %2 = vector.load %arg2[%c0_2, %c256] : memref<32x768xf32, #tpu.memory_space<vmem>>, vector<32x32xf32>
    %c0_3 = arith.constant 0 : index
    %c384 = arith.constant 384 : index
    %3 = vector.load %arg2[%c0_3, %c384] : memref<32x768xf32, #tpu.memory_space<vmem>>, vector<32x64xf32>
    %c0_4 = arith.constant 0 : index
    %c512 = arith.constant 512 : index
    %4 = vector.load %arg2[%c0_4, %c512] : memref<32x768xf32, #tpu.memory_space<vmem>>, vector<32x32xf32>
    %c0_5 = arith.constant 0 : index
    %c640 = arith.constant 640 : index
    %5 = vector.load %arg2[%c0_5, %c640] : memref<32x768xf32, #tpu.memory_space<vmem>>, vector<32x64xf32>
    %c16 = arith.constant 16 : index
    %c0_6 = arith.constant 0 : index
    %6 = vector.load %arg3[%c16, %c0_6] : memref<80x128xf32, #tpu.memory_space<vmem>>, vector<64x32xf32>
    %c0_7 = arith.constant 0 : index
    %c0_8 = arith.constant 0 : index
    %7 = vector.load %arg3[%c0_7, %c0_8] : memref<80x128xf32, #tpu.memory_space<vmem>>, vector<1x96xf32>
    %8 = vector.shape_cast %7 : vector<1x96xf32> to vector<96xf32>
    %c1 = arith.constant 1 : index
    %c0_9 = arith.constant 0 : index
    %9 = vector.load %arg3[%c1, %c0_9] : memref<80x128xf32, #tpu.memory_space<vmem>>, vector<1x32xf32>
    %10 = vector.shape_cast %9 : vector<1x32xf32> to vector<32xf32>
    %c2 = arith.constant 2 : index
    %c0_10 = arith.constant 0 : index
    %11 = vector.load %arg3[%c2, %c0_10] : memref<80x128xf32, #tpu.memory_space<vmem>>, vector<1x32xf32>
    %12 = vector.shape_cast %11 : vector<1x32xf32> to vector<32xf32>
    %c3 = arith.constant 3 : index
    %c0_11 = arith.constant 0 : index
    %13 = vector.load %arg3[%c3, %c0_11] : memref<80x128xf32, #tpu.memory_space<vmem>>, vector<1x64xf32>
    %14 = vector.shape_cast %13 : vector<1x64xf32> to vector<64xf32>
    %c4 = arith.constant 4 : index
    %c0_12 = arith.constant 0 : index
    %15 = vector.load %arg3[%c4, %c0_12] : memref<80x128xf32, #tpu.memory_space<vmem>>, vector<1x32xf32>
    %16 = vector.shape_cast %15 : vector<1x32xf32> to vector<32xf32>
    %c5 = arith.constant 5 : index
    %c0_13 = arith.constant 0 : index
    %17 = vector.load %arg3[%c5, %c0_13] : memref<80x128xf32, #tpu.memory_space<vmem>>, vector<1x32xf32>
    %18 = vector.shape_cast %17 : vector<1x32xf32> to vector<32xf32>
    %c6 = arith.constant 6 : index
    %c0_14 = arith.constant 0 : index
    %19 = vector.load %arg3[%c6, %c0_14] : memref<80x128xf32, #tpu.memory_space<vmem>>, vector<1x32xf32>
    %20 = vector.shape_cast %19 : vector<1x32xf32> to vector<32xf32>
    %c7 = arith.constant 7 : index
    %c0_15 = arith.constant 0 : index
    %21 = vector.load %arg3[%c7, %c0_15] : memref<80x128xf32, #tpu.memory_space<vmem>>, vector<1x32xf32>
    %22 = vector.shape_cast %21 : vector<1x32xf32> to vector<32xf32>
    %c8 = arith.constant 8 : index
    %c0_16 = arith.constant 0 : index
    %23 = vector.load %arg3[%c8, %c0_16] : memref<80x128xf32, #tpu.memory_space<vmem>>, vector<1x32xf32>
    %24 = vector.shape_cast %23 : vector<1x32xf32> to vector<32xf32>
    %c9 = arith.constant 9 : index
    %c0_17 = arith.constant 0 : index
    %25 = vector.load %arg3[%c9, %c0_17] : memref<80x128xf32, #tpu.memory_space<vmem>>, vector<1x32xf32>
    %26 = vector.shape_cast %25 : vector<1x32xf32> to vector<32xf32>
    %c10 = arith.constant 10 : index
    %c0_18 = arith.constant 0 : index
    %27 = vector.load %arg3[%c10, %c0_18] : memref<80x128xf32, #tpu.memory_space<vmem>>, vector<1x32xf32>
    %28 = vector.shape_cast %27 : vector<1x32xf32> to vector<32xf32>
    %c11 = arith.constant 11 : index
    %c0_19 = arith.constant 0 : index
    %29 = vector.load %arg3[%c11, %c0_19] : memref<80x128xf32, #tpu.memory_space<vmem>>, vector<1x64xf32>
    %30 = vector.shape_cast %29 : vector<1x64xf32> to vector<64xf32>
    %c12 = arith.constant 12 : index
    %c0_20 = arith.constant 0 : index
    %31 = vector.load %arg3[%c12, %c0_20] : memref<80x128xf32, #tpu.memory_space<vmem>>, vector<1x32xf32>
    %32 = vector.shape_cast %31 : vector<1x32xf32> to vector<32xf32>
    %c0_21 = arith.constant 0 : index
    %c0_22 = arith.constant 0 : index
    %c0_23 = arith.constant 0 : index
    %33 = vector.load %arg0[%c0_21, %c0_22, %c0_23] : memref<2x16x32xf32, #tpu.memory_space<vmem>>, vector<1x16x32xf32>
    %34 = vector.shape_cast %33 : vector<1x16x32xf32> to vector<16x32xf32>
    %c1_24 = arith.constant 1 : index
    %c0_25 = arith.constant 0 : index
    %c0_26 = arith.constant 0 : index
    %35 = vector.load %arg0[%c1_24, %c0_25, %c0_26] : memref<2x16x32xf32, #tpu.memory_space<vmem>>, vector<1x16x32xf32>
    %36 = vector.shape_cast %35 : vector<1x16x32xf32> to vector<16x32xf32>
    %cst = arith.constant dense<0.000000e+00> : vector<16xf32>
    %37 = vector.multi_reduction <add>, %34, %cst [1] : vector<16x32xf32> to vector<16xf32>
    %38 = vector.shape_cast %37 : vector<16xf32> to vector<16x1xf32>
    %cst_27 = arith.constant 3.200000e+01 : f32
    %39 = vector.broadcast %cst_27 : f32 to vector<16x1xf32>
    %40 = arith.divf %38, %39 : vector<16x1xf32>
    %41 = vector.broadcast %40 : vector<16x1xf32> to vector<16x32xf32>
    %42 = arith.subf %34, %41 : vector<16x32xf32>
    %43 = arith.mulf %42, %42 : vector<16x32xf32>
    %cst_28 = arith.constant dense<0.000000e+00> : vector<16xf32>
    %44 = vector.multi_reduction <add>, %43, %cst_28 [1] : vector<16x32xf32> to vector<16xf32>
    %45 = vector.shape_cast %44 : vector<16xf32> to vector<16x1xf32>
    %cst_29 = arith.constant 0.0322580636 : f32
    %46 = vector.broadcast %cst_29 : f32 to vector<16x1xf32>
    %47 = arith.mulf %45, %46 : vector<16x1xf32>
    %48 = math.sqrt %47 : vector<16x1xf32>
    %cst_30 = arith.constant 9.99999997E-7 : f32
    %49 = vector.broadcast %cst_30 : f32 to vector<16x1xf32>
    %50 = arith.addf %48, %49 : vector<16x1xf32>
    %51 = tpu.reciprocal %50 : vector<16x1xf32> -> vector<16x1xf32>
    %52 = vector.broadcast %40 : vector<16x1xf32> to vector<16x32xf32>
    %53 = arith.subf %34, %52 : vector<16x32xf32>
    %54 = vector.shape_cast %18 : vector<32xf32> to vector<1x32xf32>
    %55 = vector.broadcast %54 : vector<1x32xf32> to vector<16x32xf32>
    %56 = arith.mulf %55, %53 : vector<16x32xf32>
    %57 = vector.broadcast %51 : vector<16x1xf32> to vector<16x32xf32>
    %58 = arith.mulf %56, %57 : vector<16x32xf32>
    %59 = vector.shape_cast %24 : vector<32xf32> to vector<1x32xf32>
    %60 = vector.broadcast %59 : vector<1x32xf32> to vector<16x32xf32>
    %61 = arith.addf %58, %60 : vector<16x32xf32>
    %cst_31 = arith.constant dense<0.000000e+00> : vector<16x96xf32>
    %62 = tpu.matmul %61, %0, %cst_31 {dimension_numbers = #tpu.dot_dimension_numbers<[1], [0], [0], [1], [0, 0, 1, 1], [], []>} : vector<16x32xf32>, vector<32x96xf32>, vector<16x96xf32> -> vector<16x96xf32>
    %63 = vector.shape_cast %8 : vector<96xf32> to vector<1x96xf32>
    %64 = vector.broadcast %63 : vector<1x96xf32> to vector<16x96xf32>
    %65 = arith.addf %62, %64 : vector<16x96xf32>
    %66 = vector.extract_strided_slice %65 {offsets = [0, 0], sizes = [16, 32], strides = [1, 1]} : vector<16x96xf32> to vector<16x32xf32>
    %67 = vector.extract_strided_slice %65 {offsets = [0, 32], sizes = [16, 32], strides = [1, 1]} : vector<16x96xf32> to vector<16x32xf32>
    %68 = vector.extract_strided_slice %65 {offsets = [0, 64], sizes = [16, 32], strides = [1, 1]} : vector<16x96xf32> to vector<16x32xf32>
    %69 = vector.extract_strided_slice %66 {offsets = [0, 0], sizes = [8, 32], strides = [1, 1]} : vector<16x32xf32> to vector<8x32xf32>
    %70 = vector.extract_strided_slice %67 {offsets = [0, 0], sizes = [8, 32], strides = [1, 1]} : vector<16x32xf32> to vector<8x32xf32>
    %71 = vector.extract_strided_slice %68 {offsets = [0, 0], sizes = [8, 32], strides = [1, 1]} : vector<16x32xf32> to vector<8x32xf32>
    %72 = tpu.transpose %70, [1, 0] : vector<8x32xf32> -> vector<32x8xf32>
    %c0_32 = arith.constant 0 : index
    %c0_33 = arith.constant 0 : index
    %c0_34 = arith.constant 0 : index
    %73 = vector.load %arg1[%c0_32, %c0_33, %c0_34] : memref<4x8x8xf32, #tpu.memory_space<vmem>>, vector<1x8x8xf32>
    %74 = vector.shape_cast %73 : vector<1x8x8xf32> to vector<8x8xf32>
    %cst_35 = arith.constant 0.000000e+00 : f32
    %75 = vector.broadcast %cst_35 : f32 to vector<8x8xf32>
    %76 = arith.cmpf oeq, %74, %75 : vector<8x8xf32>
    %cst_36 = arith.constant -1.000000e+09 : f32
    %cst_37 = arith.constant 0.000000e+00 : f32
    %77 = vector.broadcast %cst_36 : f32 to vector<8x8xf32>
    %78 = vector.broadcast %cst_37 : f32 to vector<8x8xf32>
    %79 = arith.select %76, %77, %78 : vector<8x8xi1>, vector<8x8xf32>
    %80 = vector.extract_strided_slice %69 {offsets = [0, 0], sizes = [8, 8], strides = [1, 1]} : vector<8x32xf32> to vector<8x8xf32>
    %81 = vector.extract_strided_slice %72 {offsets = [0, 0], sizes = [8, 8], strides = [1, 1]} : vector<32x8xf32> to vector<8x8xf32>
    %cst_38 = arith.constant dense<0.000000e+00> : vector<8x8xf32>
    %82 = tpu.matmul %80, %81, %cst_38 {dimension_numbers = #tpu.dot_dimension_numbers<[1], [0], [0], [1], [0, 0, 1, 1], [], []>} : vector<8x8xf32>, vector<8x8xf32>, vector<8x8xf32> -> vector<8x8xf32>
    %83 = arith.addf %82, %79 : vector<8x8xf32>
    %cst_39 = arith.constant dense<0xFF800000> : vector<8xf32>
    %84 = vector.multi_reduction <maximumf>, %83, %cst_39 [1] : vector<8x8xf32> to vector<8xf32>
    %85 = vector.shape_cast %84 : vector<8xf32> to vector<8x1xf32>
    %86 = vector.broadcast %85 : vector<8x1xf32> to vector<8x8xf32>
    %87 = arith.subf %83, %86 : vector<8x8xf32>
    %88 = math.exp %87 : vector<8x8xf32>
    %cst_40 = arith.constant dense<0.000000e+00> : vector<8xf32>
    %89 = vector.multi_reduction <add>, %88, %cst_40 [1] : vector<8x8xf32> to vector<8xf32>
    %90 = vector.shape_cast %89 : vector<8xf32> to vector<8x1xf32>
    %91 = tpu.reciprocal %90 : vector<8x1xf32> -> vector<8x1xf32>
    %92 = vector.broadcast %91 : vector<8x1xf32> to vector<8x8xf32>
    %93 = arith.mulf %88, %92 : vector<8x8xf32>
    %94 = vector.extract_strided_slice %71 {offsets = [0, 0], sizes = [8, 8], strides = [1, 1]} : vector<8x32xf32> to vector<8x8xf32>
    %cst_41 = arith.constant dense<0.000000e+00> : vector<8x8xf32>
    %95 = tpu.matmul %93, %94, %cst_41 {dimension_numbers = #tpu.dot_dimension_numbers<[1], [0], [0], [1], [0, 0, 1, 1], [], []>} : vector<8x8xf32>, vector<8x8xf32>, vector<8x8xf32> -> vector<8x8xf32>
    %96 = vector.extract_strided_slice %1 {offsets = [0, 0], sizes = [8, 32], strides = [1, 1]} : vector<32x32xf32> to vector<8x32xf32>
    %cst_42 = arith.constant dense<0.000000e+00> : vector<8x32xf32>
    %97 = tpu.matmul %95, %96, %cst_42 {dimension_numbers = #tpu.dot_dimension_numbers<[1], [0], [0], [1], [0, 0, 1, 1], [], []>} : vector<8x8xf32>, vector<8x32xf32>, vector<8x32xf32> -> vector<8x32xf32>
    %98 = vector.extract_strided_slice %69 {offsets = [0, 8], sizes = [8, 8], strides = [1, 1]} : vector<8x32xf32> to vector<8x8xf32>
    %99 = vector.extract_strided_slice %72 {offsets = [8, 0], sizes = [8, 8], strides = [1, 1]} : vector<32x8xf32> to vector<8x8xf32>
    %cst_43 = arith.constant dense<0.000000e+00> : vector<8x8xf32>
    %100 = tpu.matmul %98, %99, %cst_43 {dimension_numbers = #tpu.dot_dimension_numbers<[1], [0], [0], [1], [0, 0, 1, 1], [], []>} : vector<8x8xf32>, vector<8x8xf32>, vector<8x8xf32> -> vector<8x8xf32>
    %101 = arith.addf %100, %79 : vector<8x8xf32>
    %cst_44 = arith.constant dense<0xFF800000> : vector<8xf32>
    %102 = vector.multi_reduction <maximumf>, %101, %cst_44 [1] : vector<8x8xf32> to vector<8xf32>
    %103 = vector.shape_cast %102 : vector<8xf32> to vector<8x1xf32>
    %104 = vector.broadcast %103 : vector<8x1xf32> to vector<8x8xf32>
    %105 = arith.subf %101, %104 : vector<8x8xf32>
    %106 = math.exp %105 : vector<8x8xf32>
    %cst_45 = arith.constant dense<0.000000e+00> : vector<8xf32>
    %107 = vector.multi_reduction <add>, %106, %cst_45 [1] : vector<8x8xf32> to vector<8xf32>
    %108 = vector.shape_cast %107 : vector<8xf32> to vector<8x1xf32>
    %109 = tpu.reciprocal %108 : vector<8x1xf32> -> vector<8x1xf32>
    %110 = vector.broadcast %109 : vector<8x1xf32> to vector<8x8xf32>
    %111 = arith.mulf %106, %110 : vector<8x8xf32>
    %112 = vector.extract_strided_slice %71 {offsets = [0, 8], sizes = [8, 8], strides = [1, 1]} : vector<8x32xf32> to vector<8x8xf32>
    %cst_46 = arith.constant dense<0.000000e+00> : vector<8x8xf32>
    %113 = tpu.matmul %111, %112, %cst_46 {dimension_numbers = #tpu.dot_dimension_numbers<[1], [0], [0], [1], [0, 0, 1, 1], [], []>} : vector<8x8xf32>, vector<8x8xf32>, vector<8x8xf32> -> vector<8x8xf32>
    %114 = vector.extract_strided_slice %1 {offsets = [8, 0], sizes = [8, 32], strides = [1, 1]} : vector<32x32xf32> to vector<8x32xf32>
    %cst_47 = arith.constant dense<0.000000e+00> : vector<8x32xf32>
    %115 = tpu.matmul %113, %114, %cst_47 {dimension_numbers = #tpu.dot_dimension_numbers<[1], [0], [0], [1], [0, 0, 1, 1], [], []>} : vector<8x8xf32>, vector<8x32xf32>, vector<8x32xf32> -> vector<8x32xf32>
    %116 = arith.addf %97, %115 : vector<8x32xf32>
    %117 = vector.extract_strided_slice %69 {offsets = [0, 16], sizes = [8, 8], strides = [1, 1]} : vector<8x32xf32> to vector<8x8xf32>
    %118 = vector.extract_strided_slice %72 {offsets = [16, 0], sizes = [8, 8], strides = [1, 1]} : vector<32x8xf32> to vector<8x8xf32>
    %cst_48 = arith.constant dense<0.000000e+00> : vector<8x8xf32>
    %119 = tpu.matmul %117, %118, %cst_48 {dimension_numbers = #tpu.dot_dimension_numbers<[1], [0], [0], [1], [0, 0, 1, 1], [], []>} : vector<8x8xf32>, vector<8x8xf32>, vector<8x8xf32> -> vector<8x8xf32>
    %120 = arith.addf %119, %79 : vector<8x8xf32>
    %cst_49 = arith.constant dense<0xFF800000> : vector<8xf32>
    %121 = vector.multi_reduction <maximumf>, %120, %cst_49 [1] : vector<8x8xf32> to vector<8xf32>
    %122 = vector.shape_cast %121 : vector<8xf32> to vector<8x1xf32>
    %123 = vector.broadcast %122 : vector<8x1xf32> to vector<8x8xf32>
    %124 = arith.subf %120, %123 : vector<8x8xf32>
    %125 = math.exp %124 : vector<8x8xf32>
    %cst_50 = arith.constant dense<0.000000e+00> : vector<8xf32>
    %126 = vector.multi_reduction <add>, %125, %cst_50 [1] : vector<8x8xf32> to vector<8xf32>
    %127 = vector.shape_cast %126 : vector<8xf32> to vector<8x1xf32>
    %128 = tpu.reciprocal %127 : vector<8x1xf32> -> vector<8x1xf32>
    %129 = vector.broadcast %128 : vector<8x1xf32> to vector<8x8xf32>
    %130 = arith.mulf %125, %129 : vector<8x8xf32>
    %131 = vector.extract_strided_slice %71 {offsets = [0, 16], sizes = [8, 8], strides = [1, 1]} : vector<8x32xf32> to vector<8x8xf32>
    %cst_51 = arith.constant dense<0.000000e+00> : vector<8x8xf32>
    %132 = tpu.matmul %130, %131, %cst_51 {dimension_numbers = #tpu.dot_dimension_numbers<[1], [0], [0], [1], [0, 0, 1, 1], [], []>} : vector<8x8xf32>, vector<8x8xf32>, vector<8x8xf32> -> vector<8x8xf32>
    %133 = vector.extract_strided_slice %1 {offsets = [16, 0], sizes = [8, 32], strides = [1, 1]} : vector<32x32xf32> to vector<8x32xf32>
    %cst_52 = arith.constant dense<0.000000e+00> : vector<8x32xf32>
    %134 = tpu.matmul %132, %133, %cst_52 {dimension_numbers = #tpu.dot_dimension_numbers<[1], [0], [0], [1], [0, 0, 1, 1], [], []>} : vector<8x8xf32>, vector<8x32xf32>, vector<8x32xf32> -> vector<8x32xf32>
    %135 = arith.addf %116, %134 : vector<8x32xf32>
    %136 = vector.extract_strided_slice %69 {offsets = [0, 24], sizes = [8, 8], strides = [1, 1]} : vector<8x32xf32> to vector<8x8xf32>
    %137 = vector.extract_strided_slice %72 {offsets = [24, 0], sizes = [8, 8], strides = [1, 1]} : vector<32x8xf32> to vector<8x8xf32>
    %cst_53 = arith.constant dense<0.000000e+00> : vector<8x8xf32>
    %138 = tpu.matmul %136, %137, %cst_53 {dimension_numbers = #tpu.dot_dimension_numbers<[1], [0], [0], [1], [0, 0, 1, 1], [], []>} : vector<8x8xf32>, vector<8x8xf32>, vector<8x8xf32> -> vector<8x8xf32>
    %139 = arith.addf %138, %79 : vector<8x8xf32>
    %cst_54 = arith.constant dense<0xFF800000> : vector<8xf32>
    %140 = vector.multi_reduction <maximumf>, %139, %cst_54 [1] : vector<8x8xf32> to vector<8xf32>
    %141 = vector.shape_cast %140 : vector<8xf32> to vector<8x1xf32>
    %142 = vector.broadcast %141 : vector<8x1xf32> to vector<8x8xf32>
    %143 = arith.subf %139, %142 : vector<8x8xf32>
    %144 = math.exp %143 : vector<8x8xf32>
    %cst_55 = arith.constant dense<0.000000e+00> : vector<8xf32>
    %145 = vector.multi_reduction <add>, %144, %cst_55 [1] : vector<8x8xf32> to vector<8xf32>
    %146 = vector.shape_cast %145 : vector<8xf32> to vector<8x1xf32>
    %147 = tpu.reciprocal %146 : vector<8x1xf32> -> vector<8x1xf32>
    %148 = vector.broadcast %147 : vector<8x1xf32> to vector<8x8xf32>
    %149 = arith.mulf %144, %148 : vector<8x8xf32>
    %150 = vector.extract_strided_slice %71 {offsets = [0, 24], sizes = [8, 8], strides = [1, 1]} : vector<8x32xf32> to vector<8x8xf32>
    %cst_56 = arith.constant dense<0.000000e+00> : vector<8x8xf32>
    %151 = tpu.matmul %149, %150, %cst_56 {dimension_numbers = #tpu.dot_dimension_numbers<[1], [0], [0], [1], [0, 0, 1, 1], [], []>} : vector<8x8xf32>, vector<8x8xf32>, vector<8x8xf32> -> vector<8x8xf32>
    %152 = vector.extract_strided_slice %1 {offsets = [24, 0], sizes = [8, 32], strides = [1, 1]} : vector<32x32xf32> to vector<8x32xf32>
    %cst_57 = arith.constant dense<0.000000e+00> : vector<8x32xf32>
    %153 = tpu.matmul %151, %152, %cst_57 {dimension_numbers = #tpu.dot_dimension_numbers<[1], [0], [0], [1], [0, 0, 1, 1], [], []>} : vector<8x8xf32>, vector<8x32xf32>, vector<8x32xf32> -> vector<8x32xf32>
    %154 = arith.addf %135, %153 : vector<8x32xf32>
    %155 = vector.shape_cast %10 : vector<32xf32> to vector<1x32xf32>
    %156 = vector.broadcast %155 : vector<1x32xf32> to vector<8x32xf32>
    %157 = arith.addf %154, %156 : vector<8x32xf32>
    %158 = vector.extract_strided_slice %66 {offsets = [8, 0], sizes = [8, 32], strides = [1, 1]} : vector<16x32xf32> to vector<8x32xf32>
    %159 = vector.extract_strided_slice %67 {offsets = [8, 0], sizes = [8, 32], strides = [1, 1]} : vector<16x32xf32> to vector<8x32xf32>
    %160 = vector.extract_strided_slice %68 {offsets = [8, 0], sizes = [8, 32], strides = [1, 1]} : vector<16x32xf32> to vector<8x32xf32>
    %161 = tpu.transpose %159, [1, 0] : vector<8x32xf32> -> vector<32x8xf32>
    %c1_58 = arith.constant 1 : index
    %c0_59 = arith.constant 0 : index
    %c0_60 = arith.constant 0 : index
    %162 = vector.load %arg1[%c1_58, %c0_59, %c0_60] : memref<4x8x8xf32, #tpu.memory_space<vmem>>, vector<1x8x8xf32>
    %163 = vector.shape_cast %162 : vector<1x8x8xf32> to vector<8x8xf32>
    %cst_61 = arith.constant 0.000000e+00 : f32
    %164 = vector.broadcast %cst_61 : f32 to vector<8x8xf32>
    %165 = arith.cmpf oeq, %163, %164 : vector<8x8xf32>
    %cst_62 = arith.constant -1.000000e+09 : f32
    %cst_63 = arith.constant 0.000000e+00 : f32
    %166 = vector.broadcast %cst_62 : f32 to vector<8x8xf32>
    %167 = vector.broadcast %cst_63 : f32 to vector<8x8xf32>
    %168 = arith.select %165, %166, %167 : vector<8x8xi1>, vector<8x8xf32>
    %169 = vector.extract_strided_slice %158 {offsets = [0, 0], sizes = [8, 8], strides = [1, 1]} : vector<8x32xf32> to vector<8x8xf32>
    %170 = vector.extract_strided_slice %161 {offsets = [0, 0], sizes = [8, 8], strides = [1, 1]} : vector<32x8xf32> to vector<8x8xf32>
    %cst_64 = arith.constant dense<0.000000e+00> : vector<8x8xf32>
    %171 = tpu.matmul %169, %170, %cst_64 {dimension_numbers = #tpu.dot_dimension_numbers<[1], [0], [0], [1], [0, 0, 1, 1], [], []>} : vector<8x8xf32>, vector<8x8xf32>, vector<8x8xf32> -> vector<8x8xf32>
    %172 = arith.addf %171, %168 : vector<8x8xf32>
    %cst_65 = arith.constant dense<0xFF800000> : vector<8xf32>
    %173 = vector.multi_reduction <maximumf>, %172, %cst_65 [1] : vector<8x8xf32> to vector<8xf32>
    %174 = vector.shape_cast %173 : vector<8xf32> to vector<8x1xf32>
    %175 = vector.broadcast %174 : vector<8x1xf32> to vector<8x8xf32>
    %176 = arith.subf %172, %175 : vector<8x8xf32>
    %177 = math.exp %176 : vector<8x8xf32>
    %cst_66 = arith.constant dense<0.000000e+00> : vector<8xf32>
    %178 = vector.multi_reduction <add>, %177, %cst_66 [1] : vector<8x8xf32> to vector<8xf32>
    %179 = vector.shape_cast %178 : vector<8xf32> to vector<8x1xf32>
    %180 = tpu.reciprocal %179 : vector<8x1xf32> -> vector<8x1xf32>
    %181 = vector.broadcast %180 : vector<8x1xf32> to vector<8x8xf32>
    %182 = arith.mulf %177, %181 : vector<8x8xf32>
    %183 = vector.extract_strided_slice %160 {offsets = [0, 0], sizes = [8, 8], strides = [1, 1]} : vector<8x32xf32> to vector<8x8xf32>
    %cst_67 = arith.constant dense<0.000000e+00> : vector<8x8xf32>
    %184 = tpu.matmul %182, %183, %cst_67 {dimension_numbers = #tpu.dot_dimension_numbers<[1], [0], [0], [1], [0, 0, 1, 1], [], []>} : vector<8x8xf32>, vector<8x8xf32>, vector<8x8xf32> -> vector<8x8xf32>
    %185 = vector.extract_strided_slice %1 {offsets = [0, 0], sizes = [8, 32], strides = [1, 1]} : vector<32x32xf32> to vector<8x32xf32>
    %cst_68 = arith.constant dense<0.000000e+00> : vector<8x32xf32>
    %186 = tpu.matmul %184, %185, %cst_68 {dimension_numbers = #tpu.dot_dimension_numbers<[1], [0], [0], [1], [0, 0, 1, 1], [], []>} : vector<8x8xf32>, vector<8x32xf32>, vector<8x32xf32> -> vector<8x32xf32>
    %187 = vector.extract_strided_slice %158 {offsets = [0, 8], sizes = [8, 8], strides = [1, 1]} : vector<8x32xf32> to vector<8x8xf32>
    %188 = vector.extract_strided_slice %161 {offsets = [8, 0], sizes = [8, 8], strides = [1, 1]} : vector<32x8xf32> to vector<8x8xf32>
    %cst_69 = arith.constant dense<0.000000e+00> : vector<8x8xf32>
    %189 = tpu.matmul %187, %188, %cst_69 {dimension_numbers = #tpu.dot_dimension_numbers<[1], [0], [0], [1], [0, 0, 1, 1], [], []>} : vector<8x8xf32>, vector<8x8xf32>, vector<8x8xf32> -> vector<8x8xf32>
    %190 = arith.addf %189, %168 : vector<8x8xf32>
    %cst_70 = arith.constant dense<0xFF800000> : vector<8xf32>
    %191 = vector.multi_reduction <maximumf>, %190, %cst_70 [1] : vector<8x8xf32> to vector<8xf32>
    %192 = vector.shape_cast %191 : vector<8xf32> to vector<8x1xf32>
    %193 = vector.broadcast %192 : vector<8x1xf32> to vector<8x8xf32>
    %194 = arith.subf %190, %193 : vector<8x8xf32>
    %195 = math.exp %194 : vector<8x8xf32>
    %cst_71 = arith.constant dense<0.000000e+00> : vector<8xf32>
    %196 = vector.multi_reduction <add>, %195, %cst_71 [1] : vector<8x8xf32> to vector<8xf32>
    %197 = vector.shape_cast %196 : vector<8xf32> to vector<8x1xf32>
    %198 = tpu.reciprocal %197 : vector<8x1xf32> -> vector<8x1xf32>
    %199 = vector.broadcast %198 : vector<8x1xf32> to vector<8x8xf32>
    %200 = arith.mulf %195, %199 : vector<8x8xf32>
    %201 = vector.extract_strided_slice %160 {offsets = [0, 8], sizes = [8, 8], strides = [1, 1]} : vector<8x32xf32> to vector<8x8xf32>
    %cst_72 = arith.constant dense<0.000000e+00> : vector<8x8xf32>
    %202 = tpu.matmul %200, %201, %cst_72 {dimension_numbers = #tpu.dot_dimension_numbers<[1], [0], [0], [1], [0, 0, 1, 1], [], []>} : vector<8x8xf32>, vector<8x8xf32>, vector<8x8xf32> -> vector<8x8xf32>
    %203 = vector.extract_strided_slice %1 {offsets = [8, 0], sizes = [8, 32], strides = [1, 1]} : vector<32x32xf32> to vector<8x32xf32>
    %cst_73 = arith.constant dense<0.000000e+00> : vector<8x32xf32>
    %204 = tpu.matmul %202, %203, %cst_73 {dimension_numbers = #tpu.dot_dimension_numbers<[1], [0], [0], [1], [0, 0, 1, 1], [], []>} : vector<8x8xf32>, vector<8x32xf32>, vector<8x32xf32> -> vector<8x32xf32>
    %205 = arith.addf %186, %204 : vector<8x32xf32>
    %206 = vector.extract_strided_slice %158 {offsets = [0, 16], sizes = [8, 8], strides = [1, 1]} : vector<8x32xf32> to vector<8x8xf32>
    %207 = vector.extract_strided_slice %161 {offsets = [16, 0], sizes = [8, 8], strides = [1, 1]} : vector<32x8xf32> to vector<8x8xf32>
    %cst_74 = arith.constant dense<0.000000e+00> : vector<8x8xf32>
    %208 = tpu.matmul %206, %207, %cst_74 {dimension_numbers = #tpu.dot_dimension_numbers<[1], [0], [0], [1], [0, 0, 1, 1], [], []>} : vector<8x8xf32>, vector<8x8xf32>, vector<8x8xf32> -> vector<8x8xf32>
    %209 = arith.addf %208, %168 : vector<8x8xf32>
    %cst_75 = arith.constant dense<0xFF800000> : vector<8xf32>
    %210 = vector.multi_reduction <maximumf>, %209, %cst_75 [1] : vector<8x8xf32> to vector<8xf32>
    %211 = vector.shape_cast %210 : vector<8xf32> to vector<8x1xf32>
    %212 = vector.broadcast %211 : vector<8x1xf32> to vector<8x8xf32>
    %213 = arith.subf %209, %212 : vector<8x8xf32>
    %214 = math.exp %213 : vector<8x8xf32>
    %cst_76 = arith.constant dense<0.000000e+00> : vector<8xf32>
    %215 = vector.multi_reduction <add>, %214, %cst_76 [1] : vector<8x8xf32> to vector<8xf32>
    %216 = vector.shape_cast %215 : vector<8xf32> to vector<8x1xf32>
    %217 = tpu.reciprocal %216 : vector<8x1xf32> -> vector<8x1xf32>
    %218 = vector.broadcast %217 : vector<8x1xf32> to vector<8x8xf32>
    %219 = arith.mulf %214, %218 : vector<8x8xf32>
    %220 = vector.extract_strided_slice %160 {offsets = [0, 16], sizes = [8, 8], strides = [1, 1]} : vector<8x32xf32> to vector<8x8xf32>
    %cst_77 = arith.constant dense<0.000000e+00> : vector<8x8xf32>
    %221 = tpu.matmul %219, %220, %cst_77 {dimension_numbers = #tpu.dot_dimension_numbers<[1], [0], [0], [1], [0, 0, 1, 1], [], []>} : vector<8x8xf32>, vector<8x8xf32>, vector<8x8xf32> -> vector<8x8xf32>
    %222 = vector.extract_strided_slice %1 {offsets = [16, 0], sizes = [8, 32], strides = [1, 1]} : vector<32x32xf32> to vector<8x32xf32>
    %cst_78 = arith.constant dense<0.000000e+00> : vector<8x32xf32>
    %223 = tpu.matmul %221, %222, %cst_78 {dimension_numbers = #tpu.dot_dimension_numbers<[1], [0], [0], [1], [0, 0, 1, 1], [], []>} : vector<8x8xf32>, vector<8x32xf32>, vector<8x32xf32> -> vector<8x32xf32>
    %224 = arith.addf %205, %223 : vector<8x32xf32>
    %225 = vector.extract_strided_slice %158 {offsets = [0, 24], sizes = [8, 8], strides = [1, 1]} : vector<8x32xf32> to vector<8x8xf32>
    %226 = vector.extract_strided_slice %161 {offsets = [24, 0], sizes = [8, 8], strides = [1, 1]} : vector<32x8xf32> to vector<8x8xf32>
    %cst_79 = arith.constant dense<0.000000e+00> : vector<8x8xf32>
    %227 = tpu.matmul %225, %226, %cst_79 {dimension_numbers = #tpu.dot_dimension_numbers<[1], [0], [0], [1], [0, 0, 1, 1], [], []>} : vector<8x8xf32>, vector<8x8xf32>, vector<8x8xf32> -> vector<8x8xf32>
    %228 = arith.addf %227, %168 : vector<8x8xf32>
    %cst_80 = arith.constant dense<0xFF800000> : vector<8xf32>
    %229 = vector.multi_reduction <maximumf>, %228, %cst_80 [1] : vector<8x8xf32> to vector<8xf32>
    %230 = vector.shape_cast %229 : vector<8xf32> to vector<8x1xf32>
    %231 = vector.broadcast %230 : vector<8x1xf32> to vector<8x8xf32>
    %232 = arith.subf %228, %231 : vector<8x8xf32>
    %233 = math.exp %232 : vector<8x8xf32>
    %cst_81 = arith.constant dense<0.000000e+00> : vector<8xf32>
    %234 = vector.multi_reduction <add>, %233, %cst_81 [1] : vector<8x8xf32> to vector<8xf32>
    %235 = vector.shape_cast %234 : vector<8xf32> to vector<8x1xf32>
    %236 = tpu.reciprocal %235 : vector<8x1xf32> -> vector<8x1xf32>
    %237 = vector.broadcast %236 : vector<8x1xf32> to vector<8x8xf32>
    %238 = arith.mulf %233, %237 : vector<8x8xf32>
    %239 = vector.extract_strided_slice %160 {offsets = [0, 24], sizes = [8, 8], strides = [1, 1]} : vector<8x32xf32> to vector<8x8xf32>
    %cst_82 = arith.constant dense<0.000000e+00> : vector<8x8xf32>
    %240 = tpu.matmul %238, %239, %cst_82 {dimension_numbers = #tpu.dot_dimension_numbers<[1], [0], [0], [1], [0, 0, 1, 1], [], []>} : vector<8x8xf32>, vector<8x8xf32>, vector<8x8xf32> -> vector<8x8xf32>
    %241 = vector.extract_strided_slice %1 {offsets = [24, 0], sizes = [8, 32], strides = [1, 1]} : vector<32x32xf32> to vector<8x32xf32>
    %cst_83 = arith.constant dense<0.000000e+00> : vector<8x32xf32>
    %242 = tpu.matmul %240, %241, %cst_83 {dimension_numbers = #tpu.dot_dimension_numbers<[1], [0], [0], [1], [0, 0, 1, 1], [], []>} : vector<8x8xf32>, vector<8x32xf32>, vector<8x32xf32> -> vector<8x32xf32>
    %243 = arith.addf %224, %242 : vector<8x32xf32>
    %244 = vector.shape_cast %10 : vector<32xf32> to vector<1x32xf32>
    %245 = vector.broadcast %244 : vector<1x32xf32> to vector<8x32xf32>
    %246 = arith.addf %243, %245 : vector<8x32xf32>
    %247 = tpu.concatenate %157, %246 in 0 : vector<8x32xf32>, vector<8x32xf32> -> vector<16x32xf32>
    %248 = arith.addf %34, %247 : vector<16x32xf32>
    %cst_84 = arith.constant dense<0.000000e+00> : vector<16xf32>
    %249 = vector.multi_reduction <add>, %248, %cst_84 [1] : vector<16x32xf32> to vector<16xf32>
    %250 = vector.shape_cast %249 : vector<16xf32> to vector<16x1xf32>
    %cst_85 = arith.constant 3.200000e+01 : f32
    %251 = vector.broadcast %cst_85 : f32 to vector<16x1xf32>
    %252 = arith.divf %250, %251 : vector<16x1xf32>
    %253 = vector.broadcast %252 : vector<16x1xf32> to vector<16x32xf32>
    %254 = arith.subf %248, %253 : vector<16x32xf32>
    %255 = arith.mulf %254, %254 : vector<16x32xf32>
    %cst_86 = arith.constant dense<0.000000e+00> : vector<16xf32>
    %256 = vector.multi_reduction <add>, %255, %cst_86 [1] : vector<16x32xf32> to vector<16xf32>
    %257 = vector.shape_cast %256 : vector<16xf32> to vector<16x1xf32>
    %cst_87 = arith.constant 0.0322580636 : f32
    %258 = vector.broadcast %cst_87 : f32 to vector<16x1xf32>
    %259 = arith.mulf %257, %258 : vector<16x1xf32>
    %260 = math.sqrt %259 : vector<16x1xf32>
    %cst_88 = arith.constant 9.99999997E-7 : f32
    %261 = vector.broadcast %cst_88 : f32 to vector<16x1xf32>
    %262 = arith.addf %260, %261 : vector<16x1xf32>
    %263 = tpu.reciprocal %262 : vector<16x1xf32> -> vector<16x1xf32>
    %264 = vector.broadcast %252 : vector<16x1xf32> to vector<16x32xf32>
    %265 = arith.subf %248, %264 : vector<16x32xf32>
    %266 = vector.shape_cast %20 : vector<32xf32> to vector<1x32xf32>
    %267 = vector.broadcast %266 : vector<1x32xf32> to vector<16x32xf32>
    %268 = arith.mulf %267, %265 : vector<16x32xf32>
    %269 = vector.broadcast %263 : vector<16x1xf32> to vector<16x32xf32>
    %270 = arith.mulf %268, %269 : vector<16x32xf32>
    %271 = vector.shape_cast %26 : vector<32xf32> to vector<1x32xf32>
    %272 = vector.broadcast %271 : vector<1x32xf32> to vector<16x32xf32>
    %273 = arith.addf %270, %272 : vector<16x32xf32>
    %cst_89 = arith.constant dense<0.000000e+00> : vector<16x32xf32>
    %274 = tpu.matmul %273, %2, %cst_89 {dimension_numbers = #tpu.dot_dimension_numbers<[1], [0], [0], [1], [0, 0, 1, 1], [], []>} : vector<16x32xf32>, vector<32x32xf32>, vector<16x32xf32> -> vector<16x32xf32>
    %275 = vector.shape_cast %12 : vector<32xf32> to vector<1x32xf32>
    %276 = vector.broadcast %275 : vector<1x32xf32> to vector<16x32xf32>
    %277 = arith.addf %274, %276 : vector<16x32xf32>
    %cst_90 = arith.constant dense<0.000000e+00> : vector<16x64xf32>
    %278 = tpu.matmul %36, %3, %cst_90 {dimension_numbers = #tpu.dot_dimension_numbers<[1], [0], [0], [1], [0, 0, 1, 1], [], []>} : vector<16x32xf32>, vector<32x64xf32>, vector<16x64xf32> -> vector<16x64xf32>
    %279 = vector.shape_cast %14 : vector<64xf32> to vector<1x64xf32>
    %280 = vector.broadcast %279 : vector<1x64xf32> to vector<16x64xf32>
    %281 = arith.addf %278, %280 : vector<16x64xf32>
    %282 = vector.extract_strided_slice %281 {offsets = [0, 0], sizes = [16, 32], strides = [1, 1]} : vector<16x64xf32> to vector<16x32xf32>
    %283 = vector.extract_strided_slice %281 {offsets = [0, 32], sizes = [16, 32], strides = [1, 1]} : vector<16x64xf32> to vector<16x32xf32>
    %284 = vector.extract_strided_slice %277 {offsets = [0, 0], sizes = [8, 32], strides = [1, 1]} : vector<16x32xf32> to vector<8x32xf32>
    %285 = vector.extract_strided_slice %282 {offsets = [0, 0], sizes = [8, 32], strides = [1, 1]} : vector<16x32xf32> to vector<8x32xf32>
    %286 = vector.extract_strided_slice %283 {offsets = [0, 0], sizes = [8, 32], strides = [1, 1]} : vector<16x32xf32> to vector<8x32xf32>
    %287 = tpu.transpose %285, [1, 0] : vector<8x32xf32> -> vector<32x8xf32>
    %c2_91 = arith.constant 2 : index
    %c0_92 = arith.constant 0 : index
    %c0_93 = arith.constant 0 : index
    %288 = vector.load %arg1[%c2_91, %c0_92, %c0_93] : memref<4x8x8xf32, #tpu.memory_space<vmem>>, vector<1x8x8xf32>
    %289 = vector.shape_cast %288 : vector<1x8x8xf32> to vector<8x8xf32>
    %cst_94 = arith.constant 0.000000e+00 : f32
    %290 = vector.broadcast %cst_94 : f32 to vector<8x8xf32>
    %291 = arith.cmpf oeq, %289, %290 : vector<8x8xf32>
    %cst_95 = arith.constant -1.000000e+09 : f32
    %cst_96 = arith.constant 0.000000e+00 : f32
    %292 = vector.broadcast %cst_95 : f32 to vector<8x8xf32>
    %293 = vector.broadcast %cst_96 : f32 to vector<8x8xf32>
    %294 = arith.select %291, %292, %293 : vector<8x8xi1>, vector<8x8xf32>
    %295 = vector.extract_strided_slice %284 {offsets = [0, 0], sizes = [8, 8], strides = [1, 1]} : vector<8x32xf32> to vector<8x8xf32>
    %296 = vector.extract_strided_slice %287 {offsets = [0, 0], sizes = [8, 8], strides = [1, 1]} : vector<32x8xf32> to vector<8x8xf32>
    %cst_97 = arith.constant dense<0.000000e+00> : vector<8x8xf32>
    %297 = tpu.matmul %295, %296, %cst_97 {dimension_numbers = #tpu.dot_dimension_numbers<[1], [0], [0], [1], [0, 0, 1, 1], [], []>} : vector<8x8xf32>, vector<8x8xf32>, vector<8x8xf32> -> vector<8x8xf32>
    %298 = arith.addf %297, %294 : vector<8x8xf32>
    %cst_98 = arith.constant dense<0xFF800000> : vector<8xf32>
    %299 = vector.multi_reduction <maximumf>, %298, %cst_98 [1] : vector<8x8xf32> to vector<8xf32>
    %300 = vector.shape_cast %299 : vector<8xf32> to vector<8x1xf32>
    %301 = vector.broadcast %300 : vector<8x1xf32> to vector<8x8xf32>
    %302 = arith.subf %298, %301 : vector<8x8xf32>
    %303 = math.exp %302 : vector<8x8xf32>
    %cst_99 = arith.constant dense<0.000000e+00> : vector<8xf32>
    %304 = vector.multi_reduction <add>, %303, %cst_99 [1] : vector<8x8xf32> to vector<8xf32>
    %305 = vector.shape_cast %304 : vector<8xf32> to vector<8x1xf32>
    %306 = tpu.reciprocal %305 : vector<8x1xf32> -> vector<8x1xf32>
    %307 = vector.broadcast %306 : vector<8x1xf32> to vector<8x8xf32>
    %308 = arith.mulf %303, %307 : vector<8x8xf32>
    %309 = vector.extract_strided_slice %286 {offsets = [0, 0], sizes = [8, 8], strides = [1, 1]} : vector<8x32xf32> to vector<8x8xf32>
    %cst_100 = arith.constant dense<0.000000e+00> : vector<8x8xf32>
    %310 = tpu.matmul %308, %309, %cst_100 {dimension_numbers = #tpu.dot_dimension_numbers<[1], [0], [0], [1], [0, 0, 1, 1], [], []>} : vector<8x8xf32>, vector<8x8xf32>, vector<8x8xf32> -> vector<8x8xf32>
    %311 = vector.extract_strided_slice %4 {offsets = [0, 0], sizes = [8, 32], strides = [1, 1]} : vector<32x32xf32> to vector<8x32xf32>
    %cst_101 = arith.constant dense<0.000000e+00> : vector<8x32xf32>
    %312 = tpu.matmul %310, %311, %cst_101 {dimension_numbers = #tpu.dot_dimension_numbers<[1], [0], [0], [1], [0, 0, 1, 1], [], []>} : vector<8x8xf32>, vector<8x32xf32>, vector<8x32xf32> -> vector<8x32xf32>
    %313 = vector.extract_strided_slice %284 {offsets = [0, 8], sizes = [8, 8], strides = [1, 1]} : vector<8x32xf32> to vector<8x8xf32>
    %314 = vector.extract_strided_slice %287 {offsets = [8, 0], sizes = [8, 8], strides = [1, 1]} : vector<32x8xf32> to vector<8x8xf32>
    %cst_102 = arith.constant dense<0.000000e+00> : vector<8x8xf32>
    %315 = tpu.matmul %313, %314, %cst_102 {dimension_numbers = #tpu.dot_dimension_numbers<[1], [0], [0], [1], [0, 0, 1, 1], [], []>} : vector<8x8xf32>, vector<8x8xf32>, vector<8x8xf32> -> vector<8x8xf32>
    %316 = arith.addf %315, %294 : vector<8x8xf32>
    %cst_103 = arith.constant dense<0xFF800000> : vector<8xf32>
    %317 = vector.multi_reduction <maximumf>, %316, %cst_103 [1] : vector<8x8xf32> to vector<8xf32>
    %318 = vector.shape_cast %317 : vector<8xf32> to vector<8x1xf32>
    %319 = vector.broadcast %318 : vector<8x1xf32> to vector<8x8xf32>
    %320 = arith.subf %316, %319 : vector<8x8xf32>
    %321 = math.exp %320 : vector<8x8xf32>
    %cst_104 = arith.constant dense<0.000000e+00> : vector<8xf32>
    %322 = vector.multi_reduction <add>, %321, %cst_104 [1] : vector<8x8xf32> to vector<8xf32>
    %323 = vector.shape_cast %322 : vector<8xf32> to vector<8x1xf32>
    %324 = tpu.reciprocal %323 : vector<8x1xf32> -> vector<8x1xf32>
    %325 = vector.broadcast %324 : vector<8x1xf32> to vector<8x8xf32>
    %326 = arith.mulf %321, %325 : vector<8x8xf32>
    %327 = vector.extract_strided_slice %286 {offsets = [0, 8], sizes = [8, 8], strides = [1, 1]} : vector<8x32xf32> to vector<8x8xf32>
    %cst_105 = arith.constant dense<0.000000e+00> : vector<8x8xf32>
    %328 = tpu.matmul %326, %327, %cst_105 {dimension_numbers = #tpu.dot_dimension_numbers<[1], [0], [0], [1], [0, 0, 1, 1], [], []>} : vector<8x8xf32>, vector<8x8xf32>, vector<8x8xf32> -> vector<8x8xf32>
    %329 = vector.extract_strided_slice %4 {offsets = [8, 0], sizes = [8, 32], strides = [1, 1]} : vector<32x32xf32> to vector<8x32xf32>
    %cst_106 = arith.constant dense<0.000000e+00> : vector<8x32xf32>
    %330 = tpu.matmul %328, %329, %cst_106 {dimension_numbers = #tpu.dot_dimension_numbers<[1], [0], [0], [1], [0, 0, 1, 1], [], []>} : vector<8x8xf32>, vector<8x32xf32>, vector<8x32xf32> -> vector<8x32xf32>
    %331 = arith.addf %312, %330 : vector<8x32xf32>
    %332 = vector.extract_strided_slice %284 {offsets = [0, 16], sizes = [8, 8], strides = [1, 1]} : vector<8x32xf32> to vector<8x8xf32>
    %333 = vector.extract_strided_slice %287 {offsets = [16, 0], sizes = [8, 8], strides = [1, 1]} : vector<32x8xf32> to vector<8x8xf32>
    %cst_107 = arith.constant dense<0.000000e+00> : vector<8x8xf32>
    %334 = tpu.matmul %332, %333, %cst_107 {dimension_numbers = #tpu.dot_dimension_numbers<[1], [0], [0], [1], [0, 0, 1, 1], [], []>} : vector<8x8xf32>, vector<8x8xf32>, vector<8x8xf32> -> vector<8x8xf32>
    %335 = arith.addf %334, %294 : vector<8x8xf32>
    %cst_108 = arith.constant dense<0xFF800000> : vector<8xf32>
    %336 = vector.multi_reduction <maximumf>, %335, %cst_108 [1] : vector<8x8xf32> to vector<8xf32>
    %337 = vector.shape_cast %336 : vector<8xf32> to vector<8x1xf32>
    %338 = vector.broadcast %337 : vector<8x1xf32> to vector<8x8xf32>
    %339 = arith.subf %335, %338 : vector<8x8xf32>
    %340 = math.exp %339 : vector<8x8xf32>
    %cst_109 = arith.constant dense<0.000000e+00> : vector<8xf32>
    %341 = vector.multi_reduction <add>, %340, %cst_109 [1] : vector<8x8xf32> to vector<8xf32>
    %342 = vector.shape_cast %341 : vector<8xf32> to vector<8x1xf32>
    %343 = tpu.reciprocal %342 : vector<8x1xf32> -> vector<8x1xf32>
    %344 = vector.broadcast %343 : vector<8x1xf32> to vector<8x8xf32>
    %345 = arith.mulf %340, %344 : vector<8x8xf32>
    %346 = vector.extract_strided_slice %286 {offsets = [0, 16], sizes = [8, 8], strides = [1, 1]} : vector<8x32xf32> to vector<8x8xf32>
    %cst_110 = arith.constant dense<0.000000e+00> : vector<8x8xf32>
    %347 = tpu.matmul %345, %346, %cst_110 {dimension_numbers = #tpu.dot_dimension_numbers<[1], [0], [0], [1], [0, 0, 1, 1], [], []>} : vector<8x8xf32>, vector<8x8xf32>, vector<8x8xf32> -> vector<8x8xf32>
    %348 = vector.extract_strided_slice %4 {offsets = [16, 0], sizes = [8, 32], strides = [1, 1]} : vector<32x32xf32> to vector<8x32xf32>
    %cst_111 = arith.constant dense<0.000000e+00> : vector<8x32xf32>
    %349 = tpu.matmul %347, %348, %cst_111 {dimension_numbers = #tpu.dot_dimension_numbers<[1], [0], [0], [1], [0, 0, 1, 1], [], []>} : vector<8x8xf32>, vector<8x32xf32>, vector<8x32xf32> -> vector<8x32xf32>
    %350 = arith.addf %331, %349 : vector<8x32xf32>
    %351 = vector.extract_strided_slice %284 {offsets = [0, 24], sizes = [8, 8], strides = [1, 1]} : vector<8x32xf32> to vector<8x8xf32>
    %352 = vector.extract_strided_slice %287 {offsets = [24, 0], sizes = [8, 8], strides = [1, 1]} : vector<32x8xf32> to vector<8x8xf32>
    %cst_112 = arith.constant dense<0.000000e+00> : vector<8x8xf32>
    %353 = tpu.matmul %351, %352, %cst_112 {dimension_numbers = #tpu.dot_dimension_numbers<[1], [0], [0], [1], [0, 0, 1, 1], [], []>} : vector<8x8xf32>, vector<8x8xf32>, vector<8x8xf32> -> vector<8x8xf32>
    %354 = arith.addf %353, %294 : vector<8x8xf32>
    %cst_113 = arith.constant dense<0xFF800000> : vector<8xf32>
    %355 = vector.multi_reduction <maximumf>, %354, %cst_113 [1] : vector<8x8xf32> to vector<8xf32>
    %356 = vector.shape_cast %355 : vector<8xf32> to vector<8x1xf32>
    %357 = vector.broadcast %356 : vector<8x1xf32> to vector<8x8xf32>
    %358 = arith.subf %354, %357 : vector<8x8xf32>
    %359 = math.exp %358 : vector<8x8xf32>
    %cst_114 = arith.constant dense<0.000000e+00> : vector<8xf32>
    %360 = vector.multi_reduction <add>, %359, %cst_114 [1] : vector<8x8xf32> to vector<8xf32>
    %361 = vector.shape_cast %360 : vector<8xf32> to vector<8x1xf32>
    %362 = tpu.reciprocal %361 : vector<8x1xf32> -> vector<8x1xf32>
    %363 = vector.broadcast %362 : vector<8x1xf32> to vector<8x8xf32>
    %364 = arith.mulf %359, %363 : vector<8x8xf32>
    %365 = vector.extract_strided_slice %286 {offsets = [0, 24], sizes = [8, 8], strides = [1, 1]} : vector<8x32xf32> to vector<8x8xf32>
    %cst_115 = arith.constant dense<0.000000e+00> : vector<8x8xf32>
    %366 = tpu.matmul %364, %365, %cst_115 {dimension_numbers = #tpu.dot_dimension_numbers<[1], [0], [0], [1], [0, 0, 1, 1], [], []>} : vector<8x8xf32>, vector<8x8xf32>, vector<8x8xf32> -> vector<8x8xf32>
    %367 = vector.extract_strided_slice %4 {offsets = [24, 0], sizes = [8, 32], strides = [1, 1]} : vector<32x32xf32> to vector<8x32xf32>
    %cst_116 = arith.constant dense<0.000000e+00> : vector<8x32xf32>
    %368 = tpu.matmul %366, %367, %cst_116 {dimension_numbers = #tpu.dot_dimension_numbers<[1], [0], [0], [1], [0, 0, 1, 1], [], []>} : vector<8x8xf32>, vector<8x32xf32>, vector<8x32xf32> -> vector<8x32xf32>
    %369 = arith.addf %350, %368 : vector<8x32xf32>
    %370 = vector.shape_cast %16 : vector<32xf32> to vector<1x32xf32>
    %371 = vector.broadcast %370 : vector<1x32xf32> to vector<8x32xf32>
    %372 = arith.addf %369, %371 : vector<8x32xf32>
    %373 = vector.extract_strided_slice %277 {offsets = [8, 0], sizes = [8, 32], strides = [1, 1]} : vector<16x32xf32> to vector<8x32xf32>
    %374 = vector.extract_strided_slice %282 {offsets = [8, 0], sizes = [8, 32], strides = [1, 1]} : vector<16x32xf32> to vector<8x32xf32>
    %375 = vector.extract_strided_slice %283 {offsets = [8, 0], sizes = [8, 32], strides = [1, 1]} : vector<16x32xf32> to vector<8x32xf32>
    %376 = tpu.transpose %374, [1, 0] : vector<8x32xf32> -> vector<32x8xf32>
    %c3_117 = arith.constant 3 : index
    %c0_118 = arith.constant 0 : index
    %c0_119 = arith.constant 0 : index
    %377 = vector.load %arg1[%c3_117, %c0_118, %c0_119] : memref<4x8x8xf32, #tpu.memory_space<vmem>>, vector<1x8x8xf32>
    %378 = vector.shape_cast %377 : vector<1x8x8xf32> to vector<8x8xf32>
    %cst_120 = arith.constant 0.000000e+00 : f32
    %379 = vector.broadcast %cst_120 : f32 to vector<8x8xf32>
    %380 = arith.cmpf oeq, %378, %379 : vector<8x8xf32>
    %cst_121 = arith.constant -1.000000e+09 : f32
    %cst_122 = arith.constant 0.000000e+00 : f32
    %381 = vector.broadcast %cst_121 : f32 to vector<8x8xf32>
    %382 = vector.broadcast %cst_122 : f32 to vector<8x8xf32>
    %383 = arith.select %380, %381, %382 : vector<8x8xi1>, vector<8x8xf32>
    %384 = vector.extract_strided_slice %373 {offsets = [0, 0], sizes = [8, 8], strides = [1, 1]} : vector<8x32xf32> to vector<8x8xf32>
    %385 = vector.extract_strided_slice %376 {offsets = [0, 0], sizes = [8, 8], strides = [1, 1]} : vector<32x8xf32> to vector<8x8xf32>
    %cst_123 = arith.constant dense<0.000000e+00> : vector<8x8xf32>
    %386 = tpu.matmul %384, %385, %cst_123 {dimension_numbers = #tpu.dot_dimension_numbers<[1], [0], [0], [1], [0, 0, 1, 1], [], []>} : vector<8x8xf32>, vector<8x8xf32>, vector<8x8xf32> -> vector<8x8xf32>
    %387 = arith.addf %386, %383 : vector<8x8xf32>
    %cst_124 = arith.constant dense<0xFF800000> : vector<8xf32>
    %388 = vector.multi_reduction <maximumf>, %387, %cst_124 [1] : vector<8x8xf32> to vector<8xf32>
    %389 = vector.shape_cast %388 : vector<8xf32> to vector<8x1xf32>
    %390 = vector.broadcast %389 : vector<8x1xf32> to vector<8x8xf32>
    %391 = arith.subf %387, %390 : vector<8x8xf32>
    %392 = math.exp %391 : vector<8x8xf32>
    %cst_125 = arith.constant dense<0.000000e+00> : vector<8xf32>
    %393 = vector.multi_reduction <add>, %392, %cst_125 [1] : vector<8x8xf32> to vector<8xf32>
    %394 = vector.shape_cast %393 : vector<8xf32> to vector<8x1xf32>
    %395 = tpu.reciprocal %394 : vector<8x1xf32> -> vector<8x1xf32>
    %396 = vector.broadcast %395 : vector<8x1xf32> to vector<8x8xf32>
    %397 = arith.mulf %392, %396 : vector<8x8xf32>
    %398 = vector.extract_strided_slice %375 {offsets = [0, 0], sizes = [8, 8], strides = [1, 1]} : vector<8x32xf32> to vector<8x8xf32>
    %cst_126 = arith.constant dense<0.000000e+00> : vector<8x8xf32>
    %399 = tpu.matmul %397, %398, %cst_126 {dimension_numbers = #tpu.dot_dimension_numbers<[1], [0], [0], [1], [0, 0, 1, 1], [], []>} : vector<8x8xf32>, vector<8x8xf32>, vector<8x8xf32> -> vector<8x8xf32>
    %400 = vector.extract_strided_slice %4 {offsets = [0, 0], sizes = [8, 32], strides = [1, 1]} : vector<32x32xf32> to vector<8x32xf32>
    %cst_127 = arith.constant dense<0.000000e+00> : vector<8x32xf32>
    %401 = tpu.matmul %399, %400, %cst_127 {dimension_numbers = #tpu.dot_dimension_numbers<[1], [0], [0], [1], [0, 0, 1, 1], [], []>} : vector<8x8xf32>, vector<8x32xf32>, vector<8x32xf32> -> vector<8x32xf32>
    %402 = vector.extract_strided_slice %373 {offsets = [0, 8], sizes = [8, 8], strides = [1, 1]} : vector<8x32xf32> to vector<8x8xf32>
    %403 = vector.extract_strided_slice %376 {offsets = [8, 0], sizes = [8, 8], strides = [1, 1]} : vector<32x8xf32> to vector<8x8xf32>
    %cst_128 = arith.constant dense<0.000000e+00> : vector<8x8xf32>
    %404 = tpu.matmul %402, %403, %cst_128 {dimension_numbers = #tpu.dot_dimension_numbers<[1], [0], [0], [1], [0, 0, 1, 1], [], []>} : vector<8x8xf32>, vector<8x8xf32>, vector<8x8xf32> -> vector<8x8xf32>
    %405 = arith.addf %404, %383 : vector<8x8xf32>
    %cst_129 = arith.constant dense<0xFF800000> : vector<8xf32>
    %406 = vector.multi_reduction <maximumf>, %405, %cst_129 [1] : vector<8x8xf32> to vector<8xf32>
    %407 = vector.shape_cast %406 : vector<8xf32> to vector<8x1xf32>
    %408 = vector.broadcast %407 : vector<8x1xf32> to vector<8x8xf32>
    %409 = arith.subf %405, %408 : vector<8x8xf32>
    %410 = math.exp %409 : vector<8x8xf32>
    %cst_130 = arith.constant dense<0.000000e+00> : vector<8xf32>
    %411 = vector.multi_reduction <add>, %410, %cst_130 [1] : vector<8x8xf32> to vector<8xf32>
    %412 = vector.shape_cast %411 : vector<8xf32> to vector<8x1xf32>
    %413 = tpu.reciprocal %412 : vector<8x1xf32> -> vector<8x1xf32>
    %414 = vector.broadcast %413 : vector<8x1xf32> to vector<8x8xf32>
    %415 = arith.mulf %410, %414 : vector<8x8xf32>
    %416 = vector.extract_strided_slice %375 {offsets = [0, 8], sizes = [8, 8], strides = [1, 1]} : vector<8x32xf32> to vector<8x8xf32>
    %cst_131 = arith.constant dense<0.000000e+00> : vector<8x8xf32>
    %417 = tpu.matmul %415, %416, %cst_131 {dimension_numbers = #tpu.dot_dimension_numbers<[1], [0], [0], [1], [0, 0, 1, 1], [], []>} : vector<8x8xf32>, vector<8x8xf32>, vector<8x8xf32> -> vector<8x8xf32>
    %418 = vector.extract_strided_slice %4 {offsets = [8, 0], sizes = [8, 32], strides = [1, 1]} : vector<32x32xf32> to vector<8x32xf32>
    %cst_132 = arith.constant dense<0.000000e+00> : vector<8x32xf32>
    %419 = tpu.matmul %417, %418, %cst_132 {dimension_numbers = #tpu.dot_dimension_numbers<[1], [0], [0], [1], [0, 0, 1, 1], [], []>} : vector<8x8xf32>, vector<8x32xf32>, vector<8x32xf32> -> vector<8x32xf32>
    %420 = arith.addf %401, %419 : vector<8x32xf32>
    %421 = vector.extract_strided_slice %373 {offsets = [0, 16], sizes = [8, 8], strides = [1, 1]} : vector<8x32xf32> to vector<8x8xf32>
    %422 = vector.extract_strided_slice %376 {offsets = [16, 0], sizes = [8, 8], strides = [1, 1]} : vector<32x8xf32> to vector<8x8xf32>
    %cst_133 = arith.constant dense<0.000000e+00> : vector<8x8xf32>
    %423 = tpu.matmul %421, %422, %cst_133 {dimension_numbers = #tpu.dot_dimension_numbers<[1], [0], [0], [1], [0, 0, 1, 1], [], []>} : vector<8x8xf32>, vector<8x8xf32>, vector<8x8xf32> -> vector<8x8xf32>
    %424 = arith.addf %423, %383 : vector<8x8xf32>
    %cst_134 = arith.constant dense<0xFF800000> : vector<8xf32>
    %425 = vector.multi_reduction <maximumf>, %424, %cst_134 [1] : vector<8x8xf32> to vector<8xf32>
    %426 = vector.shape_cast %425 : vector<8xf32> to vector<8x1xf32>
    %427 = vector.broadcast %426 : vector<8x1xf32> to vector<8x8xf32>
    %428 = arith.subf %424, %427 : vector<8x8xf32>
    %429 = math.exp %428 : vector<8x8xf32>
    %cst_135 = arith.constant dense<0.000000e+00> : vector<8xf32>
    %430 = vector.multi_reduction <add>, %429, %cst_135 [1] : vector<8x8xf32> to vector<8xf32>
    %431 = vector.shape_cast %430 : vector<8xf32> to vector<8x1xf32>
    %432 = tpu.reciprocal %431 : vector<8x1xf32> -> vector<8x1xf32>
    %433 = vector.broadcast %432 : vector<8x1xf32> to vector<8x8xf32>
    %434 = arith.mulf %429, %433 : vector<8x8xf32>
    %435 = vector.extract_strided_slice %375 {offsets = [0, 16], sizes = [8, 8], strides = [1, 1]} : vector<8x32xf32> to vector<8x8xf32>
    %cst_136 = arith.constant dense<0.000000e+00> : vector<8x8xf32>
    %436 = tpu.matmul %434, %435, %cst_136 {dimension_numbers = #tpu.dot_dimension_numbers<[1], [0], [0], [1], [0, 0, 1, 1], [], []>} : vector<8x8xf32>, vector<8x8xf32>, vector<8x8xf32> -> vector<8x8xf32>
    %437 = vector.extract_strided_slice %4 {offsets = [16, 0], sizes = [8, 32], strides = [1, 1]} : vector<32x32xf32> to vector<8x32xf32>
    %cst_137 = arith.constant dense<0.000000e+00> : vector<8x32xf32>
    %438 = tpu.matmul %436, %437, %cst_137 {dimension_numbers = #tpu.dot_dimension_numbers<[1], [0], [0], [1], [0, 0, 1, 1], [], []>} : vector<8x8xf32>, vector<8x32xf32>, vector<8x32xf32> -> vector<8x32xf32>
    %439 = arith.addf %420, %438 : vector<8x32xf32>
    %440 = vector.extract_strided_slice %373 {offsets = [0, 24], sizes = [8, 8], strides = [1, 1]} : vector<8x32xf32> to vector<8x8xf32>
    %441 = vector.extract_strided_slice %376 {offsets = [24, 0], sizes = [8, 8], strides = [1, 1]} : vector<32x8xf32> to vector<8x8xf32>
    %cst_138 = arith.constant dense<0.000000e+00> : vector<8x8xf32>
    %442 = tpu.matmul %440, %441, %cst_138 {dimension_numbers = #tpu.dot_dimension_numbers<[1], [0], [0], [1], [0, 0, 1, 1], [], []>} : vector<8x8xf32>, vector<8x8xf32>, vector<8x8xf32> -> vector<8x8xf32>
    %443 = arith.addf %442, %383 : vector<8x8xf32>
    %cst_139 = arith.constant dense<0xFF800000> : vector<8xf32>
    %444 = vector.multi_reduction <maximumf>, %443, %cst_139 [1] : vector<8x8xf32> to vector<8xf32>
    %445 = vector.shape_cast %444 : vector<8xf32> to vector<8x1xf32>
    %446 = vector.broadcast %445 : vector<8x1xf32> to vector<8x8xf32>
    %447 = arith.subf %443, %446 : vector<8x8xf32>
    %448 = math.exp %447 : vector<8x8xf32>
    %cst_140 = arith.constant dense<0.000000e+00> : vector<8xf32>
    %449 = vector.multi_reduction <add>, %448, %cst_140 [1] : vector<8x8xf32> to vector<8xf32>
    %450 = vector.shape_cast %449 : vector<8xf32> to vector<8x1xf32>
    %451 = tpu.reciprocal %450 : vector<8x1xf32> -> vector<8x1xf32>
    %452 = vector.broadcast %451 : vector<8x1xf32> to vector<8x8xf32>
    %453 = arith.mulf %448, %452 : vector<8x8xf32>
    %454 = vector.extract_strided_slice %375 {offsets = [0, 24], sizes = [8, 8], strides = [1, 1]} : vector<8x32xf32> to vector<8x8xf32>
    %cst_141 = arith.constant dense<0.000000e+00> : vector<8x8xf32>
    %455 = tpu.matmul %453, %454, %cst_141 {dimension_numbers = #tpu.dot_dimension_numbers<[1], [0], [0], [1], [0, 0, 1, 1], [], []>} : vector<8x8xf32>, vector<8x8xf32>, vector<8x8xf32> -> vector<8x8xf32>
    %456 = vector.extract_strided_slice %4 {offsets = [24, 0], sizes = [8, 32], strides = [1, 1]} : vector<32x32xf32> to vector<8x32xf32>
    %cst_142 = arith.constant dense<0.000000e+00> : vector<8x32xf32>
    %457 = tpu.matmul %455, %456, %cst_142 {dimension_numbers = #tpu.dot_dimension_numbers<[1], [0], [0], [1], [0, 0, 1, 1], [], []>} : vector<8x8xf32>, vector<8x32xf32>, vector<8x32xf32> -> vector<8x32xf32>
    %458 = arith.addf %439, %457 : vector<8x32xf32>
    %459 = vector.shape_cast %16 : vector<32xf32> to vector<1x32xf32>
    %460 = vector.broadcast %459 : vector<1x32xf32> to vector<8x32xf32>
    %461 = arith.addf %458, %460 : vector<8x32xf32>
    %462 = tpu.concatenate %372, %461 in 0 : vector<8x32xf32>, vector<8x32xf32> -> vector<16x32xf32>
    %463 = arith.addf %248, %462 : vector<16x32xf32>
    %cst_143 = arith.constant dense<0.000000e+00> : vector<16xf32>
    %464 = vector.multi_reduction <add>, %463, %cst_143 [1] : vector<16x32xf32> to vector<16xf32>
    %465 = vector.shape_cast %464 : vector<16xf32> to vector<16x1xf32>
    %cst_144 = arith.constant 3.200000e+01 : f32
    %466 = vector.broadcast %cst_144 : f32 to vector<16x1xf32>
    %467 = arith.divf %465, %466 : vector<16x1xf32>
    %468 = vector.broadcast %467 : vector<16x1xf32> to vector<16x32xf32>
    %469 = arith.subf %463, %468 : vector<16x32xf32>
    %470 = arith.mulf %469, %469 : vector<16x32xf32>
    %cst_145 = arith.constant dense<0.000000e+00> : vector<16xf32>
    %471 = vector.multi_reduction <add>, %470, %cst_145 [1] : vector<16x32xf32> to vector<16xf32>
    %472 = vector.shape_cast %471 : vector<16xf32> to vector<16x1xf32>
    %cst_146 = arith.constant 0.0322580636 : f32
    %473 = vector.broadcast %cst_146 : f32 to vector<16x1xf32>
    %474 = arith.mulf %472, %473 : vector<16x1xf32>
    %475 = math.sqrt %474 : vector<16x1xf32>
    %cst_147 = arith.constant 9.99999997E-7 : f32
    %476 = vector.broadcast %cst_147 : f32 to vector<16x1xf32>
    %477 = arith.addf %475, %476 : vector<16x1xf32>
    %478 = tpu.reciprocal %477 : vector<16x1xf32> -> vector<16x1xf32>
    %479 = vector.broadcast %467 : vector<16x1xf32> to vector<16x32xf32>
    %480 = arith.subf %463, %479 : vector<16x32xf32>
    %481 = vector.shape_cast %22 : vector<32xf32> to vector<1x32xf32>
    %482 = vector.broadcast %481 : vector<1x32xf32> to vector<16x32xf32>
    %483 = arith.mulf %482, %480 : vector<16x32xf32>
    %484 = vector.broadcast %478 : vector<16x1xf32> to vector<16x32xf32>
    %485 = arith.mulf %483, %484 : vector<16x32xf32>
    %486 = vector.shape_cast %28 : vector<32xf32> to vector<1x32xf32>
    %487 = vector.broadcast %486 : vector<1x32xf32> to vector<16x32xf32>
    %488 = arith.addf %485, %487 : vector<16x32xf32>
    %cst_148 = arith.constant dense<0.000000e+00> : vector<16x64xf32>
    %489 = tpu.matmul %488, %5, %cst_148 {dimension_numbers = #tpu.dot_dimension_numbers<[1], [0], [0], [1], [0, 0, 1, 1], [], []>} : vector<16x32xf32>, vector<32x64xf32>, vector<16x64xf32> -> vector<16x64xf32>
    %490 = vector.shape_cast %30 : vector<64xf32> to vector<1x64xf32>
    %491 = vector.broadcast %490 : vector<1x64xf32> to vector<16x64xf32>
    %492 = arith.addf %489, %491 : vector<16x64xf32>
    %cst_149 = arith.constant 0.000000e+00 : f32
    %493 = vector.broadcast %cst_149 : f32 to vector<16x64xf32>
    %494 = arith.maximumf %492, %493 : vector<16x64xf32>
    %cst_150 = arith.constant dense<0.000000e+00> : vector<16x32xf32>
    %495 = tpu.matmul %494, %6, %cst_150 {dimension_numbers = #tpu.dot_dimension_numbers<[1], [0], [0], [1], [0, 0, 1, 1], [], []>} : vector<16x64xf32>, vector<64x32xf32>, vector<16x32xf32> -> vector<16x32xf32>
    %496 = arith.addf %463, %495 : vector<16x32xf32>
    %497 = vector.shape_cast %32 : vector<32xf32> to vector<1x32xf32>
    %498 = vector.broadcast %497 : vector<1x32xf32> to vector<16x32xf32>
    %499 = arith.addf %496, %498 : vector<16x32xf32>
    %c0_151 = arith.constant 0 : index
    %c0_152 = arith.constant 0 : index
    %500 = vector.load %arg4[%c0_151, %c0_152] : memref<16x32xf32, #tpu.memory_space<vmem>>, vector<16x32xf32>
    tpu.vector_store %arg4[%c0_151, %c0_152], %499 {strides = array<i32>} : memref<16x32xf32, #tpu.memory_space<vmem>>, vector<16x32xf32>,
    return
  }
}

</mosaic_0001>

<bundles_post_ra>
// kernel: decoder_layer.1
= control target key start
LH: loop header
LB: loop body
LE: loop exit
PB: predicated region body
PF: predicated region fallthrough
CT: control target
= control target key end

     0   :  { %9 = vsyncpa [#allocation3], 0  ;;  %s5810_s0 = inlined_call_operand.vmem [shape: f32[2,16,32], index: 0, kind: input, shape index: {}]   ;;  %s5811_s1 = inlined_call_operand.vmem [shape: f32[4,8,8], index: 1, kind: input, shape index: {}]   ;;  %s5812_s2 = inlined_call_operand.hbm [shape: f32[32,768], index: 2, kind: input, shape index: {}]   ;;  %s5813_s3 = inlined_call_operand.vmem [shape: f32[80,128], index: 3, kind: input, shape index: {}]   ;;  %s5814_s4 = inlined_call_operand.hbm [shape: f32[16,32], index: 4, kind: output, shape index: {}]  }
   0x1   :  { %10 = vsyncpa [#allocation4], 0  ;;  %s5208_s15 = smov [#allocation2]  }
   0x2   :  { %s20_s16 = sshll.u32 %s5208_s15, 4  ;;  %s21_s16 = int_to_ptr.vmem [resolvable:$true] %s20_s16 }
   0x3   :  { %s5172_s17 = scalar_lea.vmem %s21_s16, 3072  ;;  %p5177_p1 = scmp.lt.s32.totalorder %s21_s16, %s21_s16 }
   0x4   :  { %p5173_p0 = scmp.ne.s32.totalorder %s21_s16, %s5172_s17  ;;  %p5178_p2 = scmp.lt.s32.totalorder %s5172_s17, %s5172_s17 }
   0x6   :  { %p5179_p3 = por %p5178_p2, %p5177_p1 }
   0x8   :  { %p5180_p4 = pnand %p5179_p3, %p5173_p0 }
   0xa   :  { %5183 = shalt.err (!%p5180_p4)
}
   0xb   :  { %s5209_s18 = smov 768   ;;  %s5210_s19 = smov 48  }
   0xc   :  { %26 = dma.hbm_to_vmem [thread:$0]  %s5812_s2, 3072, %s21_s16, [#allocation3], %s5209_s18, %s5209_s18, %s5210_s19  }
   0xd   :  { %5204 = dma.done.wait [#allocation3], 3072  }
   0xe   :  { %5205 = vsyncadd [#allocation3], 4294964224  ;;  %vm82_vm0 = vcmask 261120   ;;  %v5258_v0 = vld [vmem:[%s5810_s0] sm:$0xff]  ;;  %v5263_v1 = vld [vmem:[%s5810_s0 + $0x8] sm:$0xff]  ;;  %v5211_v44 = vmov 0.0  }
   0xf   :  { %v83_v2 = vsel %vm82_vm0, %v5258_v0, 0.0  ;;  %v86_v3 = vsel %vm82_vm0, %v5263_v1, 0.0  ;;  %v35_v14 = vld [vmem:[#allocation2 + $0x90] sm:$0xff]  ;;  %v34_v15 = vld [vmem:[#allocation2 + $0x60] sm:$0xff]  ;;  %v4536_v37 = vld [vmem:[%s5813_s3 + $0x8] ss:$0 sm:$0xff]  ;;  %4771 = vmatprep.subr.mxu1 %v5211_v44 }
  0x10   :  { %84 = vadd.xlane.f32.xlu0 %v83_v2  ;;  %4755 = vmatprep.subr.mxu0 %v35_v14  ;;  %v33_v16 = vld [vmem:[#allocation2 + $0x30] sm:$0xff]  ;;  %v32_v17 = vld [vmem:[#allocation2] sm:$0xff]  ;;  %vm5212_vm5 = vmmov 0   ;;  %s5213_s5 = smov 88   ;;  %s5214_s6 = smov 96   ;;  %vm227_vm6 = vcmask 64512  }
  0x11   :  { %4756 = vmatpush3.msra.mxu0 %v35_v14  ;;  %v4535_v34 = vld [vmem:[%s5813_s3 + $0x5] ss:$0 sm:$0xff]  ;;  %4773 = vmatprep.mubr.msk.f32.mxu1 %vm5212_vm5, %v5211_v44  ;;  %v4537_v45 = vld [vmem:[%s5813_s3] ss:$0 sm:$0xff]  ;;  %s5215_s7 = smov 120   ;;  %s5216_s10 = smov 64  }
  0x12   :  { %4757 = vmatprep.subr.mxu0 %v34_v15  ;;  %v221_v53 = vld [vmem:[%s5811_s1] sm:$0xff]  ;;  %s5217_s11 = smov 80   ;;  %s5218_s12 = smov 112  }
  0x13   :  { %4758 = vmatpush3.msra.mxu0 %v34_v15  ;;  %vm222_vm7 = vcmp.eq.f32.partialorder %v221_v53, 0.0  ;;  %s5219_s13 = smov 56   ;;  %s5220_s14 = smov 72  }
  0x14   :  { %87 = vadd.xlane.f32.xlu0 %v86_v3  ;;  %4759 = vmatprep.subr.mxu0 %v33_v16  ;;  %v5315_v54 = vsel %vm222_vm7, -1e+09, %v5211_v44  ;;  %s5221_s15 = smov 104   ;;  %s5222_s16 = smov 40  }
  0x15   :  { %4760 = vmatpush3.msra.mxu0 %v33_v16  ;;  %s5223_s9 = smov [#allocation5]  }
  0x16   :  { %4761 = vmatprep.subr.mxu0 %v32_v17 }
  0x17   :  { %4762 = vmatpush3.msra.mxu0 %v32_v17 }
  0x18   :  { %4766 = vmatprep.subr.mxu0 %v5211_v44 }
  0x99   :  { %v85_v4 = vpop.xlane.xlu0 %84 }
  0x9a   :  { %v90_v5 = vmul.f32 0.03125, %v85_v4 }
  0x9c   :  { %v92_v6 = vsub.f32 %v5258_v0, %v90_v5 }
  0x9d   :  { %v88_v7 = vpop.xlane.xlu0 %87 }
  0x9e   :  { %v91_v8 = vmul.f32 0.03125, %v88_v7  ;;  %v94_v9 = vmul.f32 %v92_v6, %v92_v6  ;;  %v126_v35 = vmul.f32 %v4535_v34, %v92_v6 }
  0xa0   :  { %v93_v10 = vsub.f32 %v5263_v1, %v91_v8  ;;  %v96_v11 = vsel %vm82_vm0, %v94_v9, 0.0 }
  0xa1   :  { %97 = vadd.xlane.f32.xlu1 %v96_v11 }
  0xa2   :  { %v95_v12 = vmul.f32 %v93_v10, %v93_v10  ;;  %v127_v39 = vmul.f32 %v4535_v34, %v93_v10 }
  0xa4   :  { %v99_v13 = vsel %vm82_vm0, %v95_v12, 0.0 }
  0xa5   :  { %100 = vadd.xlane.f32.xlu1 %v99_v13 }
 0x12a   :  { %v98_v18 = vpop.xlane.xlu1 %97 }
 0x12b   :  { %v102_v19 = vmul.f32 0.032258064, %v98_v18 }
 0x12d   :  { %5076 = vrsqrt.f32 %v102_v19  ;;  %vm106_vm1 = vcmp.eq.f32.partialorder %v102_v19, inf  ;;  %v109_v24 = vand.u32 2147483648, %v102_v19  ;;  %vm108_vm2 = vcmp.eq.f32.partialorder %v102_v19, 0.0 }
 0x12e   :  { %v101_v20 = vpop.xlane.xlu1 %100 }
 0x12f   :  { %v103_v21 = vmul.f32 0.032258064, %v101_v20  ;;  %v5342_v20 = vld [vmem:[#allocation2 + $0x38] sm:$0xff] }
 0x131   :  { %5078 = vrsqrt.f32 %v103_v21  ;;  %vm113_vm3 = vcmp.eq.f32.partialorder %v103_v21, inf  ;;  %v116_v30 = vand.u32 2147483648, %v103_v21  ;;  %vm115_vm4 = vcmp.eq.f32.partialorder %v103_v21, 0.0 }
 0x13a   :  { %v5077_v22 = vpop.eup %5076 }
 0x13b   :  { %v105_v23 = vmul.f32 %v5077_v22, %v102_v19 }
 0x13d   :  { %v107_v25 = vsel %vm106_vm1, %v102_v19, %v105_v23  ;;  %v5339_v19 = vld [vmem:[#allocation2 + $0x8] sm:$0xff] }
 0x13e   :  { %v5079_v26 = vpop.eup %5078  ;;  %v110_v27 = vsel %vm108_vm2, %v109_v24, %v107_v25 }
 0x13f   :  { %v112_v28 = vmul.f32 %v5079_v26, %v103_v21  ;;  %v118_v29 = vadd.f32 1e-06, %v110_v27 }
 0x141   :  { %v114_v31 = vsel %vm113_vm3, %v103_v21, %v112_v28  ;;  %5080 = vrcp.f32 %v118_v29 }
 0x142   :  { %v117_v32 = vsel %vm115_vm4, %v116_v30, %v114_v31  ;;  %vm4424_vm4 = vcmask 523264  }
 0x143   :  { %v119_v33 = vadd.f32 1e-06, %v117_v32 }
 0x145   :  { %5082 = vrcp.f32 %v119_v33 }
 0x14e   :  { %v5081_v36 = vpop.eup %5080 }
 0x14f   :  { %v128_v38 = vmul.f32 %v5081_v36, %v126_v35 }
 0x151   :  { %v134_v40 = vadd.f32 %v4536_v37, %v128_v38 }
 0x152   :  { %v5083_v41 = vpop.eup %5082 }
 0x153   :  { %v129_v42 = vmul.f32 %v5083_v41, %v127_v39  ;;  %4763 = vmatprep.mubr.msk.f32.mxu0 %vm82_vm0, %v134_v40 }
 0x155   :  { %v135_v43 = vadd.f32 %v4536_v37, %v129_v42 }
 0x157   :  { %4764 = vmatmul.mubr.msk.f32.vlgmr.msra.gmra.mxu0 %vm82_vm0, %v135_v43 }
 0x158   :  { %4768 = vmatprep.mubr.msk.f32.mxu0 %vm5212_vm5, %v5211_v44 }
 0x217   :  { %v4765_v46 = vpop.f32.mrf.mxu0 }
 0x218   :  { %v5290_v47 = vadd.f32 %v4765_v46, %v4537_v45 }
 0x219   :  { %v212_v48 = vpop.f32.mrf.mxu0 }
 0x21a   :  { %v5292_v49 = vadd.f32 %v4537_v45, %v212_v48 }
 0x21c   :  { %391 = vrot.lane.b32.xlu1 %v5292_v49, %s5213_s5  ;;  %225 = vrot.lane.b32.xlu0 %v5292_v49, %s5214_s6 }
 0x220   :  { %389 = vrot.lane.b32.xlu1 %v5292_v49, %s5215_s7 }
 0x28e   :  { %v226_v50 = vpop.permute.xlu0 %225  ;;  %v392_v51 = vpop.permute.xlu1 %391 }
 0x28f   :  { %4767 = vmatpush3.xpose.msk.msra.mxu0 %vm227_vm6, %v226_v50  ;;  %v5378_v50 = vld [vmem:[#allocation2 + $0x68] sm:$0xff] }
 0x290   :  { %4776 = vmatprep.subr.mxu0 %v5211_v44 }
 0x292   :  { %4769 = vmatmul.mubr.msk.f32.vlgmr.msra.gmra.mxu0 %vm227_vm6, %v5292_v49  ;;  %v390_v52 = vpop.permute.xlu1 %389 }
 0x293   :  { %4777 = vmatpush3.xpose.msk.msra.mxu0 %vm227_vm6, %v392_v51  ;;  %4778 = vmatprep.mubr.msk.f32.mxu0 %vm5212_vm5, %v5211_v44 }
 0x294   :  { %4786 = vmatprep.subr.mxu0 %v5211_v44 }
 0x296   :  { %4779 = vmatmul.mubr.msk.f32.vlgmr.msra.gmra.mxu0 %vm227_vm6, %v390_v52 }
 0x297   :  { %4788 = vmatprep.mubr.msk.f32.mxu0 %vm5212_vm5, %v5211_v44  ;;  %4787 = vmatpush3.msra.mxu0 %v5342_v20 }
 0x298   :  { %4796 = vmatprep.subr.mxu0 %v5211_v44 }
 0x352   :  { %v298_v55 = vpop.f32.mrf.mxu0 }
 0x353   :  { %v299_v56 = vadd.f32 %v298_v55, %v5315_v54 }
 0x354   :  { %v4770_v57 = vpop.f32.mrf.mxu0 }
 0x355   :  { %v302_v58 = vsel %vm227_vm6, %v299_v56, -inf }
 0x356   :  { %303 = vmax.xlane.f32.xlu1 %v302_v58  ;;  %v463_v59 = vpop.f32.mrf.mxu0 }
 0x357   :  { %v464_v60 = vadd.f32 %v463_v59, %v5315_v54 }
 0x358   :  { %v4780_v61 = vpop.f32.mrf.mxu0 }
 0x359   :  { %v467_v62 = vsel %vm227_vm6, %v464_v60, -inf }
 0x35a   :  { %468 = vmax.xlane.f32.xlu0 %v467_v62 }
 0x367   :  { %313 = vrot.lane.b32.xlu1 %v5292_v49, %s5216_s10 }
 0x36b   :  { %702 = vrot.lane.b32.xlu1 %v5292_v49, %s5217_s11 }
 0x36f   :  { %700 = vrot.lane.b32.xlu1 %v5292_v49, %s5218_s12 }
 0x3df   :  { %v304_v63 = vpop.xlane.xlu1 %303 }
 0x3e0   :  { %v305_v2 = vsub.f32 %v299_v56, %v304_v63 }
 0x3e2   :  { %v306_v3 = vmul.f32 1.442695, %v305_v2 }
 0x3e3   :  { %v314_v4 = vpop.permute.xlu1 %313  ;;  %v469_v5 = vpop.xlane.xlu0 %468 }
 0x3e4   :  { %5084 = vpow2.f32 %v306_v3  ;;  %v470_v6 = vsub.f32 %v464_v60, %v469_v5  ;;  %4772 = vmatpush3.msra.mxu1 %v314_v4 }
 0x3e5   :  { %4781 = vmatprep.subr.mxu1 %v5211_v44 }
 0x3e6   :  { %v471_v7 = vmul.f32 1.442695, %v470_v6 }
 0x3e7   :  { %v703_v22 = vpop.permute.xlu1 %702 }
 0x3e8   :  { %5086 = vpow2.f32 %v471_v7 }
 0x3eb   :  { %v701_v26 = vpop.permute.xlu1 %700 }
 0x3f1   :  { %v5085_v8 = vpop.eup %5084 }
 0x3f2   :  { %v308_v9 = vsel %vm227_vm6, %v5085_v8, 0.0 }
 0x3f3   :  { %309 = vadd.xlane.f32.xlu0 %v308_v9  ;;  %v5411_v9 = vld [vmem:[#allocation2 + $0x98] sm:$0xff] }
 0x3f5   :  { %v5087_v10 = vpop.eup %5086 }
 0x3f6   :  { %v473_v11 = vsel %vm227_vm6, %v5087_v10, 0.0 }
 0x3f7   :  { %474 = vadd.xlane.f32.xlu0 %v473_v11 }
 0x40d   :  { %478 = vrot.lane.b32.xlu0 %v5292_v49, %s5219_s13 }
 0x47c   :  { %v310_v12 = vpop.xlane.xlu0 %309 }
 0x47d   :  { %5088 = vrcp.f32 %v310_v12 }
 0x480   :  { %v475_v13 = vpop.xlane.xlu0 %474 }
 0x481   :  { %5090 = vrcp.f32 %v475_v13 }
 0x484   :  { %v479_v16 = vpop.permute.xlu0 %478 }
 0x48a   :  { %v5089_v14 = vpop.eup %5088 }
 0x48b   :  { %v312_v15 = vmul.f32 %v5089_v14, %v5085_v8 }
 0x48d   :  { %4774 = vmatmul.mubr.msk.f32.vlgmr.msra.gmra.mxu1 %vm227_vm6, %v312_v15 }
 0x48e   :  { %v5091_v17 = vpop.eup %5090  ;;  %4782 = vmatpush3.msra.mxu1 %v479_v16  ;;  %4783 = vmatprep.mubr.msk.f32.mxu1 %vm5212_vm5, %v5211_v44 }
 0x48f   :  { %v477_v18 = vmul.f32 %v5091_v17, %v5087_v10  ;;  %4791 = vmatprep.subr.mxu1 %v5211_v44  ;;  %v4557_v10 = vld [vmem:[%s5811_s1 + $0x8] sm:$0xff] }
 0x490   :  { %vm1185_vm8 = vcmp.eq.f32.partialorder %v4557_v10, 0.0  ;;  %v4556_v10 = vld [vmem:[%s5813_s3 + $0x1] ss:$0 sm:$0xff] }
 0x491   :  { %4784 = vmatmul.mubr.msk.f32.vlgmr.msra.gmra.mxu1 %vm227_vm6, %v477_v18  ;;  %v5420_v13 = vsel %vm1185_vm8, -1e+09, %v5211_v44 }
 0x492   :  { %4793 = vmatprep.mubr.msk.f32.mxu1 %vm5212_vm5, %v5211_v44  ;;  %4792 = vmatpush3.msra.mxu1 %v5339_v19 }
 0x493   :  { %4801 = vmatprep.subr.mxu1 %v5211_v44 }
 0x54d   :  { %v385_v21 = vpop.f32.mrf.mxu1 }
 0x54e   :  { %4794 = vmatmul.mubr.msk.f32.vlgmr.msra.gmra.mxu1 %vm227_vm6, %v385_v21 }
 0x54f   :  { %v4775_v23 = vpop.f32.mrf.mxu1  ;;  %4803 = vmatprep.mubr.msk.f32.mxu1 %vm5212_vm5, %v5211_v44 }
 0x551   :  { %v550_v24 = vpop.f32.mrf.mxu1 }
 0x552   :  { %4789 = vmatmul.mubr.msk.f32.vlgmr.msra.gmra.mxu0 %vm227_vm6, %v550_v24 }
 0x553   :  { %4797 = vmatpush3.xpose.msk.msra.mxu0 %vm227_vm6, %v703_v22  ;;  %v4785_v25 = vpop.f32.mrf.mxu1  ;;  %4798 = vmatprep.mubr.msk.f32.mxu0 %vm5212_vm5, %v5211_v44 }
 0x554   :  { %4806 = vmatprep.subr.mxu0 %v5211_v44 }
 0x556   :  { %4799 = vmatmul.mubr.msk.f32.vlgmr.msra.gmra.mxu0 %vm227_vm6, %v701_v26 }
 0x557   :  { %4808 = vmatprep.mubr.msk.f32.mxu0 %vm5212_vm5, %v5211_v44  ;;  %4807 = vmatpush3.msra.mxu0 %v5378_v50 }
 0x558   :  { %4816 = vmatprep.subr.mxu0 %v5211_v44 }
 0x60e   :  { %v696_v27 = vpop.f32.mrf.mxu1 }
 0x610   :  { %v4795_v28 = vpop.f32.mrf.mxu1 }
 0x612   :  { %v623_v29 = vpop.f32.mrf.mxu0 }
 0x613   :  { %v697_v30 = vadd.f32 %v696_v27, %v623_v29 }
 0x614   :  { %v4790_v31 = vpop.f32.mrf.mxu0 }
 0x616   :  { %v774_v32 = vpop.f32.mrf.mxu0 }
 0x617   :  { %v775_v33 = vadd.f32 %v774_v32, %v5315_v54 }
 0x618   :  { %v4800_v34 = vpop.f32.mrf.mxu0 }
 0x619   :  { %v778_v35 = vsel %vm227_vm6, %v775_v33, -inf }
 0x61a   :  { %779 = vmax.xlane.f32.xlu1 %v778_v35 }
 0x62b   :  { %941 = vrot.lane.b32.xlu1 %v5292_v49, %s5220_s14 }
 0x62f   :  { %939 = vrot.lane.b32.xlu1 %v5292_v49, %s5221_s15 }
 0x633   :  { %1188 = vrot.lane.b32.xlu1 %v5290_v47, %s5214_s6 }
 0x6a3   :  { %v780_v36 = vpop.xlane.xlu1 %779 }
 0x6a4   :  { %v781_v37 = vsub.f32 %v775_v33, %v780_v36 }
 0x6a6   :  { %v782_v38 = vmul.f32 1.442695, %v781_v37 }
 0x6a7   :  { %v942_v45 = vpop.permute.xlu1 %941 }
 0x6a8   :  { %5092 = vpow2.f32 %v782_v38 }
 0x6ab   :  { %v940_v48 = vpop.permute.xlu1 %939 }
 0x6af   :  { %v1189_v3 = vpop.permute.xlu1 %1188 }
 0x6b5   :  { %v5093_v39 = vpop.eup %5092 }
 0x6b6   :  { %v784_v40 = vsel %vm227_vm6, %v5093_v39, 0.0 }
 0x6b7   :  { %785 = vadd.xlane.f32.xlu0 %v784_v40 }
 0x6cd   :  { %789 = vrot.lane.b32.xlu0 %v5292_v49, %s5210_s19 }
 0x740   :  { %v786_v41 = vpop.xlane.xlu0 %785 }
 0x741   :  { %5094 = vrcp.f32 %v786_v41 }
 0x744   :  { %v790_v42 = vpop.permute.xlu0 %789 }
 0x745   :  { %4802 = vmatpush3.msra.mxu1 %v790_v42 }
 0x746   :  { %4811 = vmatprep.subr.mxu1 %v5211_v44 }
 0x74e   :  { %v5095_v43 = vpop.eup %5094 }
 0x74f   :  { %v788_v46 = vmul.f32 %v5095_v43, %v5093_v39 }
 0x751   :  { %4804 = vmatmul.mubr.msk.f32.vlgmr.msra.gmra.mxu1 %vm227_vm6, %v788_v46 }
 0x752   :  { %4812 = vmatpush3.xpose.msk.msra.mxu1 %vm227_vm6, %v942_v45  ;;  %4813 = vmatprep.mubr.msk.f32.mxu1 %vm5212_vm5, %v5211_v44 }
 0x753   :  { %4821 = vmatprep.subr.mxu1 %v5211_v44 }
 0x755   :  { %4814 = vmatmul.mubr.msk.f32.vlgmr.msra.gmra.mxu1 %vm227_vm6, %v940_v48 }
 0x756   :  { %4823 = vmatprep.mubr.msk.f32.mxu1 %vm5212_vm5, %v5211_v44  ;;  %4822 = vmatpush3.msra.mxu1 %v5411_v9 }
 0x757   :  { %4831 = vmatprep.subr.mxu1 %v5211_v44 }
 0x811   :  { %v861_v51 = vpop.f32.mrf.mxu1 }
 0x812   :  { %4809 = vmatmul.mubr.msk.f32.vlgmr.msra.gmra.mxu0 %vm227_vm6, %v861_v51 }
 0x813   :  { %v4805_v52 = vpop.f32.mrf.mxu1  ;;  %4818 = vmatprep.mubr.msk.f32.mxu0 %vm5212_vm5, %v5211_v44 }
 0x815   :  { %v1013_v53 = vpop.f32.mrf.mxu1 }
 0x816   :  { %v1014_v55 = vadd.f32 %v1013_v53, %v5315_v54 }
 0x817   :  { %v4815_v56 = vpop.f32.mrf.mxu1 }
 0x818   :  { %v1017_v57 = vsel %vm227_vm6, %v1014_v55, -inf }
 0x819   :  { %1018 = vmax.xlane.f32.xlu0 %v1017_v57 }
 0x82f   :  { %1028 = vrot.lane.b32.xlu0 %v5292_v49, %s5222_s16 }
 0x833   :  { %1353 = vrot.lane.b32.xlu0 %v5290_v47, %s5213_s5 }
 0x8a2   :  { %v1019_v58 = vpop.xlane.xlu0 %1018 }
 0x8a3   :  { %v1020_v59 = vsub.f32 %v1014_v55, %v1019_v58 }
 0x8a5   :  { %v1021_v60 = vmul.f32 1.442695, %v1020_v59 }
 0x8a6   :  { %v1029_v61 = vpop.permute.xlu0 %1028 }
 0x8a7   :  { %5096 = vpow2.f32 %v1021_v60  ;;  %4817 = vmatpush3.msra.mxu0 %v1029_v61 }
 0x8a8   :  { %4826 = vmatprep.subr.mxu0 %v5211_v44 }
 0x8aa   :  { %v1354_v7 = vpop.permute.xlu0 %1353 }
 0x8b4   :  { %v5097_v54 = vpop.eup %5096 }
 0x8b5   :  { %v1023_v62 = vsel %vm227_vm6, %v5097_v54, 0.0 }
 0x8b6   :  { %1024 = vadd.xlane.f32.xlu1 %v1023_v62 }
 0x8c7   :  { %1351 = vrot.lane.b32.xlu1 %v5290_v47, %s5215_s7 }
 0x8d2   :  { %v934_v63 = vpop.f32.mrf.mxu0 }
 0x8d3   :  { %v938_v49 = vadd.f32 %v934_v63, %v697_v30 }
 0x8d4   :  { %v4810_v2 = vpop.f32.mrf.mxu0 }
 0x93f   :  { %v1025_v4 = vpop.xlane.xlu1 %1024 }
 0x940   :  { %5098 = vrcp.f32 %v1025_v4 }
 0x943   :  { %v1352_v8 = vpop.permute.xlu1 %1351 }
 0x94d   :  { %v5099_v5 = vpop.eup %5098 }
 0x94e   :  { %v1027_v6 = vmul.f32 %v5099_v5, %v5097_v54 }
 0x950   :  { %4819 = vmatmul.mubr.msk.f32.vlgmr.msra.gmra.mxu0 %vm227_vm6, %v1027_v6 }
 0x951   :  { %4827 = vmatpush3.xpose.msk.msra.mxu0 %vm227_vm6, %v1189_v3  ;;  %4828 = vmatprep.mubr.msk.f32.mxu0 %vm5212_vm5, %v5211_v44 }
 0x952   :  { %4836 = vmatprep.subr.mxu0 %v5211_v44 }
 0x954   :  { %4829 = vmatmul.mubr.msk.f32.vlgmr.msra.gmra.mxu0 %vm227_vm6, %v5290_v47 }
 0x955   :  { %4837 = vmatpush3.xpose.msk.msra.mxu0 %vm227_vm6, %v1354_v7  ;;  %4838 = vmatprep.mubr.msk.f32.mxu0 %vm5212_vm5, %v5211_v44 }
 0x956   :  { %4846 = vmatprep.subr.mxu0 %v5211_v44 }
 0x958   :  { %4839 = vmatmul.mubr.msk.f32.vlgmr.msra.gmra.mxu0 %vm227_vm6, %v1352_v8 }
 0x959   :  { %4847 = vmatpush3.msra.mxu0 %v5342_v20  ;;  %4848 = vmatprep.mubr.msk.f32.mxu0 %vm5212_vm5, %v5211_v44 }
 0x95a   :  { %4856 = vmatprep.subr.mxu0 %v5211_v44 }
 0xa10   :  { %v1100_v11 = vpop.f32.mrf.mxu0 }
 0xa11   :  { %4824 = vmatmul.mubr.msk.f32.vlgmr.msra.gmra.mxu1 %vm227_vm6, %v1100_v11 }
 0xa12   :  { %v4820_v12 = vpop.f32.mrf.mxu0  ;;  %4833 = vmatprep.mubr.msk.f32.mxu1 %vm5212_vm5, %v5211_v44 }
 0xa14   :  { %v1260_v14 = vpop.f32.mrf.mxu0 }
 0xa15   :  { %v1261_v15 = vadd.f32 %v1260_v14, %v5420_v13 }
 0xa16   :  { %v4830_v16 = vpop.f32.mrf.mxu0 }
 0xa17   :  { %v1264_v17 = vsel %vm227_vm6, %v1261_v15, -inf }
 0xa18   :  { %1265 = vmax.xlane.f32.xlu0 %v1264_v17  ;;  %v1425_v18 = vpop.f32.mrf.mxu0 }
 0xa19   :  { %v1426_v20 = vadd.f32 %v1425_v18, %v5420_v13 }
 0xa1a   :  { %v4840_v21 = vpop.f32.mrf.mxu0 }
 0xa1b   :  { %v1429_v22 = vsel %vm227_vm6, %v1426_v20, -inf }
 0xa1c   :  { %1430 = vmax.xlane.f32.xlu1 %v1429_v22 }
 0xa2d   :  { %1440 = vrot.lane.b32.xlu1 %v5290_v47, %s5219_s13 }
 0xa31   :  { %1664 = vrot.lane.b32.xlu1 %v5290_v47, %s5217_s11 }
 0xa35   :  { %1662 = vrot.lane.b32.xlu1 %v5290_v47, %s5218_s12 }
 0xaa1   :  { %v1266_v23 = vpop.xlane.xlu0 %1265 }
 0xaa2   :  { %v1267_v24 = vsub.f32 %v1261_v15, %v1266_v23 }
 0xaa4   :  { %v1268_v25 = vmul.f32 1.442695, %v1267_v24 }
 0xaa5   :  { %v1431_v26 = vpop.xlane.xlu1 %1430 }
 0xaa6   :  { %5100 = vpow2.f32 %v1268_v25  ;;  %v1432_v27 = vsub.f32 %v1426_v20, %v1431_v26 }
 0xaa8   :  { %v1433_v28 = vmul.f32 1.442695, %v1432_v27 }
 0xaa9   :  { %v1441_v41 = vpop.permute.xlu1 %1440 }
 0xaaa   :  { %5102 = vpow2.f32 %v1433_v28 }
 0xaad   :  { %v1665_v46 = vpop.permute.xlu1 %1664 }
 0xab3   :  { %v5101_v29 = vpop.eup %5100 }
 0xab4   :  { %v1270_v30 = vsel %vm227_vm6, %v5101_v29, 0.0 }
 0xab5   :  { %1271 = vadd.xlane.f32.xlu0 %v1270_v30 }
 0xab7   :  { %v5103_v31 = vpop.eup %5102 }
 0xab8   :  { %v1435_v32 = vsel %vm227_vm6, %v5103_v31, 0.0 }
 0xab9   :  { %1436 = vadd.xlane.f32.xlu0 %v1435_v32 }
 0xacf   :  { %1275 = vrot.lane.b32.xlu0 %v5290_v47, %s5216_s10 }
 0xad1   :  { %v1173_v33 = vpop.f32.mrf.mxu1 }
 0xad2   :  { %v5438_v34 = vadd.f32 %v1173_v33, %v938_v49 }
 0xad3   :  { %v4825_v35 = vpop.f32.mrf.mxu1 }
 0xad4   :  { %v1182_v14 = vadd.f32 %v4556_v10, %v5438_v34 }
 0xad6   :  { %v5491_v17 = vadd.f32 %v1182_v14, %v5258_v0 }
 0xad8   :  { %v2143_v20 = vsel %vm82_vm0, %v5491_v17, 0.0 }
 0xb3e   :  { %v1272_v36 = vpop.xlane.xlu0 %1271 }
 0xb3f   :  { %5104 = vrcp.f32 %v1272_v36 }
 0xb42   :  { %v1437_v37 = vpop.xlane.xlu0 %1436 }
 0xb43   :  { %5106 = vrcp.f32 %v1437_v37 }
 0xb46   :  { %v1276_v38 = vpop.permute.xlu0 %1275 }
 0xb47   :  { %4832 = vmatpush3.msra.mxu1 %v1276_v38 }
 0xb48   :  { %4841 = vmatprep.subr.mxu1 %v5211_v44 }
 0xb4c   :  { %v5105_v39 = vpop.eup %5104 }
 0xb4d   :  { %v1274_v40 = vmul.f32 %v5105_v39, %v5101_v29 }
 0xb4f   :  { %4834 = vmatmul.mubr.msk.f32.vlgmr.msra.gmra.mxu1 %vm227_vm6, %v1274_v40 }
 0xb50   :  { %v5107_v42 = vpop.eup %5106  ;;  %4842 = vmatpush3.msra.mxu1 %v1441_v41  ;;  %4843 = vmatprep.mubr.msk.f32.mxu1 %vm5212_vm5, %v5211_v44 }
 0xb51   :  { %v1439_v43 = vmul.f32 %v5107_v42, %v5103_v31  ;;  %4851 = vmatprep.subr.mxu1 %v5211_v44 }
 0xb53   :  { %4844 = vmatmul.mubr.msk.f32.vlgmr.msra.gmra.mxu1 %vm227_vm6, %v1439_v43 }
 0xb54   :  { %4852 = vmatpush3.msra.mxu1 %v5339_v19  ;;  %4853 = vmatprep.mubr.msk.f32.mxu1 %vm5212_vm5, %v5211_v44  ;;  %v1663_v19 = vpop.permute.xlu1 %1662 }
 0xb55   :  { %4861 = vmatprep.subr.mxu1 %v5211_v44 }
 0xc0f   :  { %v1347_v45 = vpop.f32.mrf.mxu1 }
 0xc10   :  { %4854 = vmatmul.mubr.msk.f32.vlgmr.msra.gmra.mxu1 %vm227_vm6, %v1347_v45 }
 0xc11   :  { %v4835_v48 = vpop.f32.mrf.mxu1  ;;  %4863 = vmatprep.mubr.msk.f32.mxu1 %vm5212_vm5, %v5211_v44 }
 0xc13   :  { %v1512_v51 = vpop.f32.mrf.mxu1 }
 0xc14   :  { %4849 = vmatmul.mubr.msk.f32.vlgmr.msra.gmra.mxu0 %vm227_vm6, %v1512_v51 }
 0xc15   :  { %4857 = vmatpush3.xpose.msk.msra.mxu0 %vm227_vm6, %v1665_v46  ;;  %v4845_v52 = vpop.f32.mrf.mxu1  ;;  %4858 = vmatprep.mubr.msk.f32.mxu0 %vm5212_vm5, %v5211_v44 }
 0xc16   :  { %4866 = vmatprep.subr.mxu0 %v5211_v44 }
 0xc18   :  { %4859 = vmatmul.mubr.msk.f32.vlgmr.msra.gmra.mxu0 %vm227_vm6, %v1663_v19 }
 0xc19   :  { %4867 = vmatpush3.msra.mxu0 %v5378_v50  ;;  %4868 = vmatprep.mubr.msk.f32.mxu0 %vm5212_vm5, %v5211_v44 }
 0xc1a   :  { %4876 = vmatprep.subr.mxu0 %v5211_v44 }
 0xcd0   :  { %v1658_v53 = vpop.f32.mrf.mxu1 }
 0xcd2   :  { %v4855_v55 = vpop.f32.mrf.mxu1 }
 0xcd4   :  { %v1585_v56 = vpop.f32.mrf.mxu0 }
 0xcd5   :  { %v1659_v57 = vadd.f32 %v1658_v53, %v1585_v56 }
 0xcd6   :  { %v4850_v58 = vpop.f32.mrf.mxu0 }
 0xcd8   :  { %v1736_v59 = vpop.f32.mrf.mxu0 }
 0xcd9   :  { %v1737_v60 = vadd.f32 %v1736_v59, %v5420_v13  ;;  %v4574_v59 = vld [vmem:[%s5813_s3 + $0x6] ss:$0 sm:$0xff] }
 0xcda   :  { %v4860_v61 = vpop.f32.mrf.mxu0 }
 0xcdb   :  { %v1740_v54 = vsel %vm227_vm6, %v1737_v60, -inf }
 0xcdc   :  { %1741 = vmax.xlane.f32.xlu0 %v1740_v54  ;;  %v4575_v54 = vld [vmem:[%s5813_s3 + $0x9] ss:$0 sm:$0xff] }
 0xcf2   :  { %1751 = vrot.lane.b32.xlu0 %v5290_v47, %s5210_s19 }
 0xcf6   :  { %1901 = vrot.lane.b32.xlu0 %v5290_v47, %s5221_s15 }
 0xd65   :  { %v1742_v50 = vpop.xlane.xlu0 %1741 }
 0xd66   :  { %v1743_v62 = vsub.f32 %v1737_v60, %v1742_v50 }
 0xd68   :  { %v1744_v63 = vmul.f32 1.442695, %v1743_v62  ;;  %v47_v62 = vld [vmem:[#allocation2 + $0xa8] sm:$0xff] }
 0xd69   :  { %v1752_v49 = vpop.permute.xlu0 %1751 }
 0xd6a   :  { %5108 = vpow2.f32 %v1744_v63  ;;  %4862 = vmatpush3.msra.mxu1 %v1752_v49  ;;  %v46_v63 = vld [vmem:[#allocation2 + $0x78] sm:$0xff]  ;;  %v43_v49 = vld [vmem:[#allocation2 + $0xa0] sm:$0xff] }
 0xd6b   :  { %4871 = vmatprep.subr.mxu1 %v5211_v44 }
 0xd6d   :  { %v1902_v8 = vpop.permute.xlu0 %1901 }
 0xd77   :  { %v5109_v2 = vpop.eup %5108 }
 0xd78   :  { %v1746_v3 = vsel %vm227_vm6, %v5109_v2, 0.0 }
 0xd79   :  { %1747 = vadd.xlane.f32.xlu1 %v1746_v3  ;;  %v45_v3 = vld [vmem:[#allocation2 + $0x48] sm:$0xff] }
 0xd8a   :  { %1903 = vrot.lane.b32.xlu1 %v5290_v47, %s5220_s14 }
 0xe02   :  { %v1748_v4 = vpop.xlane.xlu1 %1747 }
 0xe03   :  { %5110 = vrcp.f32 %v1748_v4  ;;  %v42_v4 = vld [vmem:[#allocation2 + $0x70] sm:$0xff] }
 0xe06   :  { %v1904_v7 = vpop.permute.xlu1 %1903 }
 0xe10   :  { %v5111_v5 = vpop.eup %5110 }
 0xe11   :  { %v1750_v6 = vmul.f32 %v5111_v5, %v5109_v2  ;;  %v4533_v5 = vld [vmem:[%s5810_s0 + $0x10] sm:$0xff] }
 0xe13   :  { %4864 = vmatmul.mubr.msk.f32.vlgmr.msra.gmra.mxu1 %vm227_vm6, %v1750_v6  ;;  %v44_v6 = vld [vmem:[#allocation2 + $0x18] sm:$0xff] }
 0xe14   :  { %4872 = vmatpush3.xpose.msk.msra.mxu1 %vm227_vm6, %v1904_v7  ;;  %4873 = vmatprep.mubr.msk.f32.mxu1 %vm5212_vm5, %v5211_v44  ;;  %v41_v7 = vld [vmem:[#allocation2 + $0x40] sm:$0xff] }
 0xe15   :  { %4881 = vmatprep.subr.mxu1 %v5211_v44 }
 0xe17   :  { %4874 = vmatmul.mubr.msk.f32.vlgmr.msra.gmra.mxu1 %vm227_vm6, %v1902_v8  ;;  %v4534_v8 = vld [vmem:[%s5810_s0 + $0x18] sm:$0xff] }
 0xe18   :  { %4882 = vmatpush3.msra.mxu1 %v5411_v9  ;;  %4883 = vmatprep.mubr.msk.f32.mxu1 %vm5212_vm5, %v5211_v44 }
 0xe19   :  { %4897 = vmatprep.subr.mxu1 %v47_v62 }
 0xed3   :  { %v1823_v11 = vpop.f32.mrf.mxu1 }
 0xed4   :  { %4869 = vmatmul.mubr.msk.f32.vlgmr.msra.gmra.mxu0 %vm227_vm6, %v1823_v11 }
 0xed5   :  { %v4865_v12 = vpop.f32.mrf.mxu1  ;;  %4878 = vmatprep.mubr.msk.f32.mxu0 %vm5212_vm5, %v5211_v44 }
 0xed7   :  { %v1975_v15 = vpop.f32.mrf.mxu1 }
 0xed8   :  { %v1976_v16 = vadd.f32 %v1975_v15, %v5420_v13 }
 0xed9   :  { %v4875_v9 = vpop.f32.mrf.mxu1 }
 0xeda   :  { %v1979_v18 = vsel %vm227_vm6, %v1976_v16, -inf }
 0xedb   :  { %1980 = vmax.xlane.f32.xlu1 %v1979_v18 }
 0xedf   :  { %2144 = vadd.xlane.f32.xlu1 %v2143_v20 }
 0xf64   :  { %v1981_v21 = vpop.xlane.xlu1 %1980 }
 0xf65   :  { %v1982_v22 = vsub.f32 %v1976_v16, %v1981_v21 }
 0xf67   :  { %v1983_v23 = vmul.f32 1.442695, %v1982_v22 }
 0xf68   :  { %v2145_v33 = vpop.xlane.xlu1 %2144 }
 0xf69   :  { %5112 = vpow2.f32 %v1983_v23  ;;  %v2149_v34 = vmul.f32 0.03125, %v2145_v33 }
 0xf6b   :  { %v2151_v37 = vsub.f32 %v5491_v17, %v2149_v34 }
 0xf6d   :  { %v2153_v41 = vmul.f32 %v2151_v37, %v2151_v37  ;;  %v2185_v60 = vmul.f32 %v4574_v59, %v2151_v37 }
 0xf6f   :  { %v2155_v42 = vsel %vm82_vm0, %v2153_v41, 0.0 }
 0xf76   :  { %v5113_v24 = vpop.eup %5112 }
 0xf77   :  { %v1985_v25 = vsel %vm227_vm6, %v5113_v24, 0.0 }
 0xf78   :  { %1986 = vadd.xlane.f32.xlu0 %v1985_v25  ;;  %v4579_v25 = vld [vmem:[%s5813_s3 + $0x3] ss:$0 sm:$0xff] }
 0xf8e   :  { %1990 = vrot.lane.b32.xlu0 %v5290_v47, %s5222_s16 }
 0xf94   :  { %v1896_v0 = vpop.f32.mrf.mxu0 }
 0xf95   :  { %v1900_v13 = vadd.f32 %v1896_v0, %v1659_v57 }
 0xf96   :  { %v4870_v26 = vpop.f32.mrf.mxu0 }
0x1001   :  { %v1987_v27 = vpop.xlane.xlu0 %1986 }
0x1002   :  { %5114 = vrcp.f32 %v1987_v27 }
0x1005   :  { %v1991_v28 = vpop.permute.xlu0 %1990 }
0x1006   :  { %4877 = vmatpush3.msra.mxu0 %v1991_v28  ;;  %v4576_v28 = vld [vmem:[%s5813_s3 + $0x2] ss:$0 sm:$0xff] }
0x1007   :  { %4886 = vmatprep.subr.mxu0 %v43_v49 }
0x100f   :  { %v5115_v29 = vpop.eup %5114 }
0x1010   :  { %v1989_v30 = vmul.f32 %v5115_v29, %v5113_v24 }
0x1012   :  { %4879 = vmatmul.mubr.msk.f32.vlgmr.msra.gmra.mxu0 %vm227_vm6, %v1989_v30 }
0x1013   :  { %4887 = vmatpush3.msra.mxu0 %v43_v49  ;;  %v5595_v49 = vld [vmem:[#allocation2 + $0x20] sm:$0xff] }
0x1014   :  { %4888 = vmatprep.subr.mxu0 %v42_v4 }
0x1015   :  { %4889 = vmatpush3.msra.mxu0 %v42_v4 }
0x1016   :  { %4890 = vmatprep.subr.mxu0 %v41_v7 }
0x1017   :  { %4891 = vmatpush3.msra.mxu0 %v41_v7 }
0x10d2   :  { %v2062_v31 = vpop.f32.mrf.mxu0 }
0x10d3   :  { %4884 = vmatmul.mubr.msk.f32.vlgmr.msra.gmra.mxu1 %vm227_vm6, %v2062_v31 }
0x10d4   :  { %v4880_v32 = vpop.f32.mrf.mxu0  ;;  %4898 = vmatpush3.msra.mxu1 %v47_v62  ;;  %4905 = vmatprep.mubr.msk.f32.mxu1 %vm82_vm0, %v4533_v5 }
0x10d5   :  { %4899 = vmatprep.subr.mxu1 %v46_v63 }
0x10d6   :  { %4900 = vmatpush3.msra.mxu1 %v46_v63 }
0x10d7   :  { %4901 = vmatprep.subr.mxu1 %v45_v3 }
0x10d8   :  { %4902 = vmatpush3.msra.mxu1 %v45_v3 }
0x10d9   :  { %4903 = vmatprep.subr.mxu1 %v44_v6 }
0x10da   :  { %4904 = vmatpush3.msra.mxu1 %v44_v6 }
0x10db   :  { %4906 = vmatmul.mubr.msk.f32.vlgmr.msra.gmra.mxu1 %vm82_vm0, %v4534_v8  ;;  %4913 = vmatprep.subr.mxu1 %v5211_v44 }
0x10dc   :  { %4915 = vmatprep.mubr.msk.f32.mxu1 %vm5212_vm5, %v5211_v44 }
0x1193   :  { %v2135_v35 = vpop.f32.mrf.mxu1 }
0x1194   :  { %v2139_v36 = vadd.f32 %v2135_v35, %v1900_v13  ;;  %v4582_v35 = vld [vmem:[%s5811_s1 + $0x10] sm:$0xff] }
0x1195   :  { %v4885_v47 = vpop.f32.mrf.mxu1  ;;  %vm2367_vm13 = vcmp.eq.f32.partialorder %v4582_v35, 0.0 }
0x1196   :  { %v2140_v38 = vadd.f32 %v4556_v10, %v2139_v36  ;;  %v40_v10 = vld [vmem:[#allocation2 + $0x10] sm:$0xff]  ;;  %v5571_v36 = vsel %vm2367_vm13, -1e+09, %v5211_v44 }
0x1197   :  { %4892 = vmatprep.subr.mxu0 %v40_v10 }
0x1198   :  { %v5503_v39 = vadd.f32 %v2140_v38, %v5263_v1  ;;  %4893 = vmatpush3.msra.mxu0 %v40_v10 }
0x1199   :  { %4908 = vmatprep.subr.mxu0 %v5211_v44 }
0x119a   :  { %v2146_v40 = vsel %vm82_vm0, %v5503_v39, 0.0 }
0x119b   :  { %2147 = vadd.xlane.f32.xlu1 %v2146_v40  ;;  %v4907_v0 = vpop.f32.mrf.mxu1 }
0x119c   :  { %v5540_v13 = vadd.f32 %v4907_v0, %v4579_v25 }
0x119d   :  { %v2356_v26 = vpop.f32.mrf.mxu1 }
0x119e   :  { %v5542_v27 = vadd.f32 %v4579_v25, %v2356_v26 }
0x119f   :  { %2156 = vadd.xlane.f32.xlu1 %v2155_v42 }
0x1224   :  { %v2148_v43 = vpop.xlane.xlu1 %2147 }
0x1225   :  { %v2150_v45 = vmul.f32 0.03125, %v2148_v43 }
0x1227   :  { %v5509_v46 = vsub.f32 %v5503_v39, %v2150_v45 }
0x1228   :  { %v2157_v48 = vpop.xlane.xlu1 %2156 }
0x1229   :  { %v2161_v51 = vmul.f32 0.032258064, %v2157_v48  ;;  %v2154_v52 = vmul.f32 %v5509_v46, %v5509_v46  ;;  %v2186_v21 = vmul.f32 %v4574_v59, %v5509_v46 }
0x122b   :  { %5116 = vrsqrt.f32 %v2161_v51  ;;  %v2158_v1 = vsel %vm82_vm0, %v2154_v52, 0.0  ;;  %vm2165_vm9 = vcmp.eq.f32.partialorder %v2161_v51, inf  ;;  %v2168_v55 = vand.u32 2147483648, %v2161_v51 }
0x122c   :  { %2159 = vadd.xlane.f32.xlu1 %v2158_v1  ;;  %vm2167_vm10 = vcmp.eq.f32.partialorder %v2161_v51, 0.0 }
0x1238   :  { %v5117_v19 = vpop.eup %5116 }
0x1239   :  { %v2164_v53 = vmul.f32 %v5117_v19, %v2161_v51 }
0x123b   :  { %v2166_v56 = vsel %vm2165_vm9, %v2161_v51, %v2164_v53 }
0x123c   :  { %v2169_v57 = vsel %vm2167_vm10, %v2168_v55, %v2166_v56 }
0x123d   :  { %v2177_v58 = vadd.f32 1e-06, %v2169_v57  ;;  %2534 = vrot.lane.b32.xlu1 %v5542_v27, %s5215_s7 }
0x123f   :  { %5118 = vrcp.f32 %v2177_v58 }
0x124c   :  { %v5119_v61 = vpop.eup %5118 }
0x124d   :  { %v2187_v50 = vmul.f32 %v5119_v61, %v2185_v60 }
0x124f   :  { %v2193_v2 = vadd.f32 %v4575_v54, %v2187_v50 }
0x1251   :  { %4894 = vmatprep.mubr.msk.f32.mxu0 %vm82_vm0, %v2193_v2  ;;  %v5599_v2 = vld [vmem:[#allocation2 + $0x50] sm:$0xff] }
0x12b5   :  { %v2160_v11 = vpop.xlane.xlu1 %2159 }
0x12b6   :  { %v2162_v12 = vmul.f32 0.032258064, %v2160_v11 }
0x12b8   :  { %5120 = vrsqrt.f32 %v2162_v12  ;;  %vm2172_vm11 = vcmp.eq.f32.partialorder %v2162_v12, inf  ;;  %v2175_v16 = vand.u32 2147483648, %v2162_v12  ;;  %vm2174_vm12 = vcmp.eq.f32.partialorder %v2162_v12, 0.0 }
0x12b9   :  { %v2535_v33 = vpop.permute.xlu1 %2534 }
0x12c5   :  { %v5121_v14 = vpop.eup %5120 }
0x12c6   :  { %v2171_v15 = vmul.f32 %v5121_v14, %v2162_v12 }
0x12c8   :  { %v2173_v9 = vsel %vm2172_vm11, %v2162_v12, %v2171_v15 }
0x12c9   :  { %v2176_v18 = vsel %vm2174_vm12, %v2175_v16, %v2173_v9 }
0x12ca   :  { %v2178_v20 = vadd.f32 1e-06, %v2176_v18 }
0x12cc   :  { %5122 = vrcp.f32 %v2178_v20 }
0x12d9   :  { %v5123_v22 = vpop.eup %5122 }
0x12da   :  { %v2188_v23 = vmul.f32 %v5123_v22, %v2186_v21 }
0x12dc   :  { %v2194_v24 = vadd.f32 %v4575_v54, %v2188_v23 }
0x12de   :  { %4895 = vmatmul.mubr.msk.f32.vlgmr.msra.gmra.mxu0 %vm82_vm0, %v2194_v24 }
0x12df   :  { %4910 = vmatprep.mubr.msk.f32.mxu0 %vm5212_vm5, %v5211_v44  ;;  %4909 = vmatpush3.xpose.msk.msra.mxu0 %vm227_vm6, %v5542_v27 }
0x12e0   :  { %4918 = vmatprep.subr.mxu0 %v5211_v44 }
0x139e   :  { %v4896_v29 = vpop.f32.mrf.mxu0 }
0x139f   :  { %v5552_v30 = vadd.f32 %v4896_v29, %v4576_v28 }
0x13a0   :  { %v2271_v31 = vpop.f32.mrf.mxu0 }
0x13a1   :  { %v5554_v32 = vadd.f32 %v4576_v28, %v2271_v31 }
0x13a3   :  { %2532 = vrot.lane.b32.xlu0 %v5554_v32, %s5215_s7  ;;  %4911 = vmatmul.mubr.msk.f32.vlgmr.msra.gmra.mxu0 %vm227_vm6, %v5554_v32 }
0x13a4   :  { %4919 = vmatpush3.xpose.msk.msra.mxu0 %vm227_vm6, %v2535_v33  ;;  %4920 = vmatprep.mubr.msk.f32.mxu0 %vm5212_vm5, %v5211_v44  ;;  %v5632_v33 = vld [vmem:[#allocation2 + $0x80] sm:$0xff] }
0x13a5   :  { %4928 = vmatprep.subr.mxu0 %v5211_v44 }
0x1415   :  { %v2533_v34 = vpop.permute.xlu0 %2532 }
0x1416   :  { %4921 = vmatmul.mubr.msk.f32.vlgmr.msra.gmra.mxu0 %vm227_vm6, %v2533_v34 }
0x1417   :  { %4930 = vmatprep.mubr.msk.f32.mxu0 %vm5212_vm5, %v5211_v44  ;;  %4929 = vmatpush3.msra.mxu0 %v5599_v2 }
0x1418   :  { %4938 = vmatprep.subr.mxu0 %v5211_v44 }
0x1463   :  { %v2441_v47 = vpop.f32.mrf.mxu0 }
0x1464   :  { %v2442_v37 = vadd.f32 %v2441_v47, %v5571_v36 }
0x1465   :  { %v4912_v38 = vpop.f32.mrf.mxu0 }
0x1466   :  { %v2445_v40 = vsel %vm227_vm6, %v2442_v37, -inf }
0x1467   :  { %2446 = vmax.xlane.f32.xlu0 %v2445_v40 }
0x14d6   :  { %v2606_v41 = vpop.f32.mrf.mxu0 }
0x14d7   :  { %v2607_v42 = vadd.f32 %v2606_v41, %v5571_v36 }
0x14d8   :  { %v4922_v43 = vpop.f32.mrf.mxu0 }
0x14d9   :  { %v2610_v45 = vsel %vm227_vm6, %v2607_v42, -inf }
0x14da   :  { %2611 = vmax.xlane.f32.xlu1 %v2610_v45 }
0x14eb   :  { %2621 = vrot.lane.b32.xlu1 %v5542_v27, %s5213_s5 }
0x14ef   :  { %2843 = vrot.lane.b32.xlu1 %v5554_v32, %s5218_s12 }
0x14f0   :  { %v2447_v46 = vpop.xlane.xlu0 %2446 }
0x14f1   :  { %v2448_v48 = vsub.f32 %v2442_v37, %v2447_v46 }
0x14f3   :  { %v2449_v51 = vmul.f32 1.442695, %v2448_v48 }
0x14f5   :  { %5124 = vpow2.f32 %v2449_v51 }
0x1502   :  { %v5125_v52 = vpop.eup %5124 }
0x1503   :  { %v2451_v1 = vsel %vm227_vm6, %v5125_v52, 0.0 }
0x1504   :  { %2452 = vadd.xlane.f32.xlu0 %v2451_v1 }
0x1563   :  { %v2612_v19 = vpop.xlane.xlu1 %2611 }
0x1564   :  { %v2613_v53 = vsub.f32 %v2607_v42, %v2612_v19 }
0x1566   :  { %v2614_v55 = vmul.f32 1.442695, %v2613_v53 }
0x1567   :  { %v2622_v50 = vpop.permute.xlu1 %2621 }
0x1568   :  { %5126 = vpow2.f32 %v2614_v55 }
0x156b   :  { %v2844_v8 = vpop.permute.xlu1 %2843 }
0x1575   :  { %v5127_v56 = vpop.eup %5126 }
0x1576   :  { %v2616_v57 = vsel %vm227_vm6, %v5127_v56, 0.0 }
0x1577   :  { %2617 = vadd.xlane.f32.xlu0 %v2616_v57  ;;  %v4600_v57 = vld [vmem:[%s5811_s1 + $0x18] sm:$0xff] }
0x1578   :  { %vm3328_vm14 = vcmp.eq.f32.partialorder %v4600_v57, 0.0  ;;  %v4599_v57 = vld [vmem:[%s5813_s3 + $0x4] ss:$0 sm:$0xff] }
0x158d   :  { %2456 = vrot.lane.b32.xlu0 %v5542_v27, %s5214_s6  ;;  %v2453_v58 = vpop.xlane.xlu0 %2452 }
0x158e   :  { %5128 = vrcp.f32 %v2453_v58 }
0x1591   :  { %2845 = vrot.lane.b32.xlu0 %v5542_v27, %s5218_s12 }
0x159b   :  { %v5129_v60 = vpop.eup %5128 }
0x159c   :  { %v2455_v54 = vmul.f32 %v5129_v60, %v5125_v52  ;;  %v5675_v60 = vsel %vm3328_vm14, -1e+09, %v5211_v44 }
0x1600   :  { %v2618_v59 = vpop.xlane.xlu0 %2617 }
0x1601   :  { %5130 = vrcp.f32 %v2618_v59 }
0x1604   :  { %v2457_v61 = vpop.permute.xlu0 %2456 }
0x1605   :  { %4914 = vmatpush3.msra.mxu1 %v2457_v61 }
0x1606   :  { %4916 = vmatmul.mubr.msk.f32.vlgmr.msra.gmra.mxu1 %vm227_vm6, %v2455_v54  ;;  %4923 = vmatprep.subr.mxu1 %v5211_v44 }
0x1607   :  { %4924 = vmatpush3.msra.mxu1 %v2622_v50  ;;  %4925 = vmatprep.mubr.msk.f32.mxu1 %vm5212_vm5, %v5211_v44 }
0x1608   :  { %4933 = vmatprep.subr.mxu1 %v5211_v44  ;;  %v2846_v6 = vpop.permute.xlu0 %2845 }
0x160e   :  { %v5131_v62 = vpop.eup %5130 }
0x160f   :  { %v2620_v63 = vmul.f32 %v5131_v62, %v5127_v56  ;;  %v5666_v56 = vld [vmem:[#allocation2 + $0xb0] sm:$0xff] }
0x1611   :  { %4926 = vmatmul.mubr.msk.f32.vlgmr.msra.gmra.mxu1 %vm227_vm6, %v2620_v63 }
0x1612   :  { %4935 = vmatprep.mubr.msk.f32.mxu1 %vm5212_vm5, %v5211_v44  ;;  %4934 = vmatpush3.msra.mxu1 %v5595_v49 }
0x1613   :  { %4943 = vmatprep.subr.mxu1 %v5211_v44 }
0x16c6   :  { %v2528_v3 = vpop.f32.mrf.mxu1 }
0x16c7   :  { %4936 = vmatmul.mubr.msk.f32.vlgmr.msra.gmra.mxu1 %vm227_vm6, %v2528_v3 }
0x16c8   :  { %v4917_v4 = vpop.f32.mrf.mxu1  ;;  %4945 = vmatprep.mubr.msk.f32.mxu1 %vm5212_vm5, %v5211_v44 }
0x16d1   :  { %v2693_v5 = vpop.f32.mrf.mxu1 }
0x16d2   :  { %4931 = vmatmul.mubr.msk.f32.vlgmr.msra.gmra.mxu0 %vm227_vm6, %v2693_v5 }
0x16d3   :  { %4939 = vmatpush3.xpose.msk.msra.mxu0 %vm227_vm6, %v2846_v6  ;;  %v4927_v7 = vpop.f32.mrf.mxu1  ;;  %4940 = vmatprep.mubr.msk.f32.mxu0 %vm5212_vm5, %v5211_v44 }
0x16d4   :  { %4948 = vmatprep.subr.mxu0 %v5211_v44 }
0x16d6   :  { %4941 = vmatmul.mubr.msk.f32.vlgmr.msra.gmra.mxu0 %vm227_vm6, %v2844_v8 }
0x16d7   :  { %4950 = vmatprep.mubr.msk.f32.mxu0 %vm5212_vm5, %v5211_v44  ;;  %4949 = vmatpush3.msra.mxu0 %v5632_v33 }
0x16d8   :  { %4958 = vmatprep.subr.mxu0 %v5211_v44 }
0x1787   :  { %v2839_v10 = vpop.f32.mrf.mxu1 }
0x1789   :  { %v4937_v11 = vpop.f32.mrf.mxu1 }
0x1792   :  { %v2766_v12 = vpop.f32.mrf.mxu0 }
0x1793   :  { %v2840_v14 = vadd.f32 %v2839_v10, %v2766_v12 }
0x1794   :  { %v4932_v15 = vpop.f32.mrf.mxu0 }
0x1796   :  { %v2917_v16 = vpop.f32.mrf.mxu0 }
0x1797   :  { %v2918_v9 = vadd.f32 %v2917_v16, %v5571_v36 }
0x1798   :  { %v4942_v18 = vpop.f32.mrf.mxu0 }
0x1799   :  { %v2921_v20 = vsel %vm227_vm6, %v2918_v9, -inf }
0x179a   :  { %2922 = vmax.xlane.f32.xlu0 %v2921_v20 }
0x17b0   :  { %2932 = vrot.lane.b32.xlu0 %v5542_v27, %s5217_s11 }
0x17b4   :  { %3082 = vrot.lane.b32.xlu0 %v5554_v32, %s5221_s15 }
0x1823   :  { %v2923_v21 = vpop.xlane.xlu0 %2922 }
0x1824   :  { %v2924_v22 = vsub.f32 %v2918_v9, %v2923_v21 }
0x1826   :  { %v2925_v23 = vmul.f32 1.442695, %v2924_v22 }
0x1827   :  { %v2933_v24 = vpop.permute.xlu0 %2932 }
0x1828   :  { %5132 = vpow2.f32 %v2925_v23  ;;  %4944 = vmatpush3.msra.mxu1 %v2933_v24 }
0x1829   :  { %4953 = vmatprep.subr.mxu1 %v5211_v44 }
0x182b   :  { %v3083_v32 = vpop.permute.xlu0 %3082 }
0x1835   :  { %v5133_v25 = vpop.eup %5132 }
0x1836   :  { %v2927_v0 = vsel %vm227_vm6, %v5133_v25, 0.0 }
0x1837   :  { %2928 = vadd.xlane.f32.xlu1 %v2927_v0 }
0x1848   :  { %3084 = vrot.lane.b32.xlu1 %v5542_v27, %s5221_s15 }
0x18c0   :  { %v2929_v26 = vpop.xlane.xlu1 %2928 }
0x18c1   :  { %5134 = vrcp.f32 %v2929_v26 }
0x18c4   :  { %v3085_v31 = vpop.permute.xlu1 %3084 }
0x18ce   :  { %v5135_v28 = vpop.eup %5134 }
0x18cf   :  { %v2931_v29 = vmul.f32 %v5135_v28, %v5133_v25 }
0x18d1   :  { %4946 = vmatmul.mubr.msk.f32.vlgmr.msra.gmra.mxu1 %vm227_vm6, %v2931_v29 }
0x18d2   :  { %4954 = vmatpush3.xpose.msk.msra.mxu1 %vm227_vm6, %v3085_v31  ;;  %4955 = vmatprep.mubr.msk.f32.mxu1 %vm5212_vm5, %v5211_v44 }
0x18d3   :  { %4963 = vmatprep.subr.mxu1 %v5211_v44 }
0x18d5   :  { %4956 = vmatmul.mubr.msk.f32.vlgmr.msra.gmra.mxu1 %vm227_vm6, %v3083_v32 }
0x18d6   :  { %4965 = vmatprep.mubr.msk.f32.mxu1 %vm5212_vm5, %v5211_v44  ;;  %4964 = vmatpush3.msra.mxu1 %v5666_v56 }
0x18d7   :  { %4973 = vmatprep.subr.mxu1 %v5211_v44 }
0x1991   :  { %v3004_v34 = vpop.f32.mrf.mxu1 }
0x1992   :  { %4951 = vmatmul.mubr.msk.f32.vlgmr.msra.gmra.mxu0 %vm227_vm6, %v3004_v34 }
0x1993   :  { %v4947_v35 = vpop.f32.mrf.mxu1  ;;  %4960 = vmatprep.mubr.msk.f32.mxu0 %vm5212_vm5, %v5211_v44 }
0x1995   :  { %v3156_v47 = vpop.f32.mrf.mxu1 }
0x1996   :  { %v3157_v37 = vadd.f32 %v3156_v47, %v5571_v36 }
0x1997   :  { %v4957_v38 = vpop.f32.mrf.mxu1 }
0x1998   :  { %v3160_v40 = vsel %vm227_vm6, %v3157_v37, -inf }
0x1999   :  { %3161 = vmax.xlane.f32.xlu1 %v3160_v40 }
0x19aa   :  { %3495 = vrot.lane.b32.xlu1 %v5540_v13, %s5215_s7 }
0x19ae   :  { %3493 = vrot.lane.b32.xlu1 %v5552_v30, %s5215_s7  ;;  %s4521_s7 = sshll.u32 %s5223_s9, 4  ;;  %s4522_s7 = int_to_ptr.vmem [resolvable:$true] %s4521_s7 }
0x19af   :  { %s5184_s10 = scalar_lea.vmem %s4522_s7, 256  ;;  %p5189_p6 = scmp.lt.s32.totalorder %s4522_s7, %s4522_s7 }
0x19b0   :  { %p5185_p5 = scmp.ne.s32.totalorder %s4522_s7, %s5184_s10  ;;  %p5190_p7 = scmp.lt.s32.totalorder %s5184_s10, %s5184_s10 }
0x19b2   :  { %p5191_p8 = por %p5190_p7, %p5189_p6 }
0x19b4   :  { %p5192_p9 = pnand %p5191_p8, %p5185_p5 }
0x1a22   :  { %v3162_v41 = vpop.xlane.xlu1 %3161 }
0x1a23   :  { %v3163_v42 = vsub.f32 %v3157_v37, %v3162_v41 }
0x1a25   :  { %v3164_v43 = vmul.f32 1.442695, %v3163_v42 }
0x1a26   :  { %v3496_v55 = vpop.permute.xlu1 %3495 }
0x1a27   :  { %5136 = vpow2.f32 %v3164_v43 }
0x1a34   :  { %v5137_v45 = vpop.eup %5136 }
0x1a35   :  { %v3166_v46 = vsel %vm227_vm6, %v5137_v45, 0.0 }
0x1a36   :  { %3167 = vadd.xlane.f32.xlu0 %v3166_v46 }
0x1a4c   :  { %3171 = vrot.lane.b32.xlu0 %v5542_v27, %s5220_s14  ;;  %v3494_v27 = vpop.permute.xlu1 %3493 }
0x1a52   :  { %v3077_v36 = vpop.f32.mrf.mxu0 }
0x1a53   :  { %v3081_v48 = vadd.f32 %v3077_v36, %v2840_v14 }
0x1a54   :  { %v4952_v51 = vpop.f32.mrf.mxu0 }
0x1abf   :  { %v3168_v52 = vpop.xlane.xlu0 %3167 }
0x1ac0   :  { %5138 = vrcp.f32 %v3168_v52 }
0x1ac3   :  { %v3172_v1 = vpop.permute.xlu0 %3171 }
0x1ac4   :  { %4959 = vmatpush3.msra.mxu0 %v3172_v1 }
0x1ac5   :  { %4968 = vmatprep.subr.mxu0 %v5211_v44 }
0x1acd   :  { %v5139_v19 = vpop.eup %5138 }
0x1ace   :  { %v3170_v53 = vmul.f32 %v5139_v19, %v5137_v45 }
0x1ad0   :  { %4961 = vmatmul.mubr.msk.f32.vlgmr.msra.gmra.mxu0 %vm227_vm6, %v3170_v53 }
0x1ad1   :  { %4969 = vmatpush3.xpose.msk.msra.mxu0 %vm227_vm6, %v5540_v13  ;;  %4970 = vmatprep.mubr.msk.f32.mxu0 %vm5212_vm5, %v5211_v44 }
0x1ad2   :  { %4978 = vmatprep.subr.mxu0 %v5211_v44 }
0x1ad4   :  { %4971 = vmatmul.mubr.msk.f32.vlgmr.msra.gmra.mxu0 %vm227_vm6, %v5552_v30 }
0x1ad5   :  { %4979 = vmatpush3.xpose.msk.msra.mxu0 %vm227_vm6, %v3496_v55  ;;  %4980 = vmatprep.mubr.msk.f32.mxu0 %vm5212_vm5, %v5211_v44 }
0x1ad6   :  { %4988 = vmatprep.subr.mxu0 %v5211_v44 }
0x1ad8   :  { %4981 = vmatmul.mubr.msk.f32.vlgmr.msra.gmra.mxu0 %vm227_vm6, %v3494_v27 }
0x1ad9   :  { %4989 = vmatpush3.msra.mxu0 %v5599_v2  ;;  %4990 = vmatprep.mubr.msk.f32.mxu0 %vm5212_vm5, %v5211_v44 }
0x1ada   :  { %4998 = vmatprep.subr.mxu0 %v5211_v44 }
0x1b90   :  { %v3243_v58 = vpop.f32.mrf.mxu0 }
0x1b91   :  { %4966 = vmatmul.mubr.msk.f32.vlgmr.msra.gmra.mxu1 %vm227_vm6, %v3243_v58 }
0x1b92   :  { %v4962_v59 = vpop.f32.mrf.mxu0  ;;  %4975 = vmatprep.mubr.msk.f32.mxu1 %vm5212_vm5, %v5211_v44 }
0x1b94   :  { %v3402_v61 = vpop.f32.mrf.mxu0 }
0x1b95   :  { %v3403_v54 = vadd.f32 %v3402_v61, %v5675_v60 }
0x1b96   :  { %v4972_v50 = vpop.f32.mrf.mxu0 }
0x1b97   :  { %v3406_v62 = vsel %vm227_vm6, %v3403_v54, -inf }
0x1b98   :  { %3407 = vmax.xlane.f32.xlu0 %v3406_v62  ;;  %v3567_v63 = vpop.f32.mrf.mxu0 }
0x1b99   :  { %v3568_v2 = vadd.f32 %v3567_v63, %v5675_v60 }
0x1b9a   :  { %v4982_v3 = vpop.f32.mrf.mxu0 }
0x1b9b   :  { %v3571_v4 = vsel %vm227_vm6, %v3568_v2, -inf }
0x1b9c   :  { %3572 = vmax.xlane.f32.xlu1 %v3571_v4 }
0x1bad   :  { %3582 = vrot.lane.b32.xlu1 %v5540_v13, %s5213_s5 }
0x1bb1   :  { %3806 = vrot.lane.b32.xlu1 %v5540_v13, %s5218_s12 }
0x1bb5   :  { %3804 = vrot.lane.b32.xlu1 %v5552_v30, %s5218_s12 }
0x1c21   :  { %v3408_v5 = vpop.xlane.xlu0 %3407 }
0x1c22   :  { %v3409_v6 = vsub.f32 %v3403_v54, %v3408_v5 }
0x1c24   :  { %v3410_v7 = vmul.f32 1.442695, %v3409_v6 }
0x1c25   :  { %v3573_v8 = vpop.xlane.xlu1 %3572 }
0x1c26   :  { %5140 = vpow2.f32 %v3410_v7  ;;  %v3574_v10 = vsub.f32 %v3568_v2, %v3573_v8 }
0x1c28   :  { %v3575_v11 = vmul.f32 1.442695, %v3574_v10 }
0x1c29   :  { %v3583_v0 = vpop.permute.xlu1 %3582 }
0x1c2a   :  { %5142 = vpow2.f32 %v3575_v11 }
0x1c2d   :  { %v3807_v31 = vpop.permute.xlu1 %3806 }
0x1c33   :  { %v5141_v12 = vpop.eup %5140 }
0x1c34   :  { %v3412_v14 = vsel %vm227_vm6, %v5141_v12, 0.0 }
0x1c35   :  { %3413 = vadd.xlane.f32.xlu0 %v3412_v14 }
0x1c37   :  { %v5143_v15 = vpop.eup %5142 }
0x1c38   :  { %v3577_v16 = vsel %vm227_vm6, %v5143_v15, 0.0 }
0x1c39   :  { %3578 = vadd.xlane.f32.xlu0 %v3577_v16 }
0x1c4f   :  { %3417 = vrot.lane.b32.xlu0 %v5540_v13, %s5214_s6 }
0x1c51   :  { %v3316_v9 = vpop.f32.mrf.mxu1 }
0x1c52   :  { %v5693_v18 = vadd.f32 %v3316_v9, %v3081_v48 }
0x1c53   :  { %v4967_v20 = vpop.f32.mrf.mxu1 }
0x1c54   :  { %v3325_v61 = vadd.f32 %v4599_v57, %v5693_v18 }
0x1c56   :  { %v5746_v62 = vadd.f32 %v3325_v61, %v5491_v17 }
0x1c58   :  { %v4285_v2 = vsel %vm82_vm0, %v5746_v62, 0.0 }
0x1cbe   :  { %v3414_v21 = vpop.xlane.xlu0 %3413 }
0x1cbf   :  { %5144 = vrcp.f32 %v3414_v21 }
0x1cc2   :  { %v3579_v22 = vpop.xlane.xlu0 %3578 }
0x1cc3   :  { %5146 = vrcp.f32 %v3579_v22 }
0x1cc6   :  { %v3418_v23 = vpop.permute.xlu0 %3417 }
0x1cc7   :  { %4974 = vmatpush3.msra.mxu1 %v3418_v23 }
0x1cc8   :  { %4983 = vmatprep.subr.mxu1 %v5211_v44 }
0x1ccc   :  { %v5145_v24 = vpop.eup %5144 }
0x1ccd   :  { %v3416_v25 = vmul.f32 %v5145_v24, %v5141_v12 }
0x1ccf   :  { %4976 = vmatmul.mubr.msk.f32.vlgmr.msra.gmra.mxu1 %vm227_vm6, %v3416_v25 }
0x1cd0   :  { %v5147_v26 = vpop.eup %5146  ;;  %4984 = vmatpush3.msra.mxu1 %v3583_v0  ;;  %4985 = vmatprep.mubr.msk.f32.mxu1 %vm5212_vm5, %v5211_v44 }
0x1cd1   :  { %v3581_v28 = vmul.f32 %v5147_v26, %v5143_v15  ;;  %4993 = vmatprep.subr.mxu1 %v5211_v44 }
0x1cd3   :  { %4986 = vmatmul.mubr.msk.f32.vlgmr.msra.gmra.mxu1 %vm227_vm6, %v3581_v28 }
0x1cd4   :  { %4994 = vmatpush3.msra.mxu1 %v5595_v49  ;;  %4995 = vmatprep.mubr.msk.f32.mxu1 %vm5212_vm5, %v5211_v44  ;;  %v3805_v49 = vpop.permute.xlu1 %3804 }
0x1cd5   :  { %5003 = vmatprep.subr.mxu1 %v5211_v44 }
0x1d8f   :  { %v3489_v29 = vpop.f32.mrf.mxu1 }
0x1d90   :  { %4996 = vmatmul.mubr.msk.f32.vlgmr.msra.gmra.mxu1 %vm227_vm6, %v3489_v29 }
0x1d91   :  { %v4977_v32 = vpop.f32.mrf.mxu1  ;;  %5005 = vmatprep.mubr.msk.f32.mxu1 %vm5212_vm5, %v5211_v44 }
0x1d93   :  { %v3654_v34 = vpop.f32.mrf.mxu1 }
0x1d94   :  { %4991 = vmatmul.mubr.msk.f32.vlgmr.msra.gmra.mxu0 %vm227_vm6, %v3654_v34 }
0x1d95   :  { %4999 = vmatpush3.xpose.msk.msra.mxu0 %vm227_vm6, %v3807_v31  ;;  %v4987_v35 = vpop.f32.mrf.mxu1  ;;  %5000 = vmatprep.mubr.msk.f32.mxu0 %vm5212_vm5, %v5211_v44 }
0x1d96   :  { %5008 = vmatprep.subr.mxu0 %v5211_v44 }
0x1d98   :  { %5001 = vmatmul.mubr.msk.f32.vlgmr.msra.gmra.mxu0 %vm227_vm6, %v3805_v49 }
0x1d99   :  { %5009 = vmatpush3.msra.mxu0 %v5632_v33  ;;  %5010 = vmatprep.mubr.msk.f32.mxu0 %vm5212_vm5, %v5211_v44 }
0x1d9a   :  { %5018 = vmatprep.subr.mxu0 %v5211_v44 }
0x1e50   :  { %v3800_v47 = vpop.f32.mrf.mxu1 }
0x1e52   :  { %v4997_v37 = vpop.f32.mrf.mxu1 }
0x1e54   :  { %v3727_v38 = vpop.f32.mrf.mxu0 }
0x1e55   :  { %v3801_v40 = vadd.f32 %v3800_v47, %v3727_v38 }
0x1e56   :  { %v4992_v41 = vpop.f32.mrf.mxu0 }
0x1e57   :  { %v4617_v41 = vld [vmem:[%s5813_s3 + $0x7] ss:$0 sm:$0xff] }
0x1e58   :  { %v3878_v42 = vpop.f32.mrf.mxu0 }
0x1e59   :  { %v3879_v43 = vadd.f32 %v3878_v42, %v5675_v60 }
0x1e5a   :  { %v5002_v45 = vpop.f32.mrf.mxu0 }
0x1e5b   :  { %v3882_v46 = vsel %vm227_vm6, %v3879_v43, -inf  ;;  %v4618_v45 = vld [vmem:[%s5813_s3 + $0xa] ss:$0 sm:$0xff] }
0x1e5c   :  { %3883 = vmax.xlane.f32.xlu0 %v3882_v46 }
0x1e72   :  { %3893 = vrot.lane.b32.xlu0 %v5540_v13, %s5217_s11 }
0x1e76   :  { %4043 = vrot.lane.b32.xlu0 %v5552_v30, %s5221_s15 }
0x1ee5   :  { %v3884_v33 = vpop.xlane.xlu0 %3883 }
0x1ee6   :  { %v3885_v36 = vsub.f32 %v3879_v43, %v3884_v33  ;;  %v55_v33 = vld [vmem:[#allocation2 + $0xb8] sm:$0xff] }
0x1ee8   :  { %v3886_v48 = vmul.f32 1.442695, %v3885_v36  ;;  %v54_v36 = vld [vmem:[#allocation2 + $0x88] sm:$0xff] }
0x1ee9   :  { %v3894_v51 = vpop.permute.xlu0 %3893 }
0x1eea   :  { %5148 = vpow2.f32 %v3886_v48  ;;  %5004 = vmatpush3.msra.mxu1 %v3894_v51  ;;  %v53_v51 = vld [vmem:[#allocation2 + $0x58] sm:$0xff] }
0x1eeb   :  { %5013 = vmatprep.subr.mxu1 %v5211_v44 }
0x1eed   :  { %v4044_v27 = vpop.permute.xlu0 %4043 }
0x1ef7   :  { %v5149_v52 = vpop.eup %5148 }
0x1ef8   :  { %v3888_v1 = vsel %vm227_vm6, %v5149_v52, 0.0 }
0x1ef9   :  { %3889 = vadd.xlane.f32.xlu1 %v3888_v1  ;;  %v63_v1 = vld [vmem:[%s5813_s3 + $0x48] sm:$0xff] }
0x1f0a   :  { %4045 = vrot.lane.b32.xlu1 %v5540_v13, %s5221_s15 }
0x1f82   :  { %v3890_v19 = vpop.xlane.xlu1 %3889 }
0x1f83   :  { %5150 = vrcp.f32 %v3890_v19  ;;  %v62_v19 = vld [vmem:[%s5813_s3 + $0x40] sm:$0xff] }
0x1f86   :  { %v4046_v30 = vpop.permute.xlu1 %4045 }
0x1f90   :  { %v5151_v53 = vpop.eup %5150 }
0x1f91   :  { %v3892_v55 = vmul.f32 %v5151_v53, %v5149_v52  ;;  %v52_v52 = vld [vmem:[#allocation2 + $0x28] sm:$0xff]  ;;  %v61_v53 = vld [vmem:[%s5813_s3 + $0x38] sm:$0xff] }
0x1f93   :  { %5006 = vmatmul.mubr.msk.f32.vlgmr.msra.gmra.mxu1 %vm227_vm6, %v3892_v55  ;;  %v60_v55 = vld [vmem:[%s5813_s3 + $0x30] sm:$0xff] }
0x1f94   :  { %5014 = vmatpush3.xpose.msk.msra.mxu1 %vm227_vm6, %v4046_v30  ;;  %5015 = vmatprep.mubr.msk.f32.mxu1 %vm5212_vm5, %v5211_v44 }
0x1f95   :  { %5023 = vmatprep.subr.mxu1 %v5211_v44 }
0x1f97   :  { %5016 = vmatmul.mubr.msk.f32.vlgmr.msra.gmra.mxu1 %vm227_vm6, %v4044_v27 }
0x1f98   :  { %5024 = vmatpush3.msra.mxu1 %v5666_v56  ;;  %5025 = vmatprep.mubr.msk.f32.mxu1 %vm5212_vm5, %v5211_v44 }
0x1f99   :  { %5039 = vmatprep.subr.mxu1 %v63_v1 }
0x2053   :  { %v3965_v58 = vpop.f32.mrf.mxu1 }
0x2054   :  { %5011 = vmatmul.mubr.msk.f32.vlgmr.msra.gmra.mxu0 %vm227_vm6, %v3965_v58 }
0x2055   :  { %v5007_v59 = vpop.f32.mrf.mxu1  ;;  %5020 = vmatprep.mubr.msk.f32.mxu0 %vm5212_vm5, %v5211_v44 }
0x2057   :  { %v4117_v54 = vpop.f32.mrf.mxu1 }
0x2058   :  { %v4118_v50 = vadd.f32 %v4117_v54, %v5675_v60 }
0x2059   :  { %v5017_v56 = vpop.f32.mrf.mxu1 }
0x205a   :  { %v4121_v63 = vsel %vm227_vm6, %v4118_v50, -inf }
0x205b   :  { %4122 = vmax.xlane.f32.xlu1 %v4121_v63 }
0x205f   :  { %4286 = vadd.xlane.f32.xlu1 %v4285_v2 }
0x20e4   :  { %v4123_v3 = vpop.xlane.xlu1 %4122 }
0x20e5   :  { %v4124_v4 = vsub.f32 %v4118_v50, %v4123_v3 }
0x20e7   :  { %v4125_v5 = vmul.f32 1.442695, %v4124_v4  ;;  %v59_v4 = vld [vmem:[%s5813_s3 + $0x28] sm:$0xff] }
0x20e8   :  { %v4287_v16 = vpop.xlane.xlu1 %4286 }
0x20e9   :  { %5152 = vpow2.f32 %v4125_v5  ;;  %v4291_v9 = vmul.f32 0.03125, %v4287_v16  ;;  %v58_v5 = vld [vmem:[%s5813_s3 + $0x20] sm:$0xff] }
0x20eb   :  { %v4293_v21 = vsub.f32 %v5746_v62, %v4291_v9 }
0x20ed   :  { %v4295_v25 = vmul.f32 %v4293_v21, %v4293_v21  ;;  %v4327_v42 = vmul.f32 %v4617_v41, %v4293_v21 }
0x20ef   :  { %v4297_v0 = vsel %vm82_vm0, %v4295_v25, 0.0 }
0x20f6   :  { %v5153_v44 = vpop.eup %5152 }
0x20f7   :  { %v4127_v6 = vsel %vm227_vm6, %v5153_v44, 0.0 }
0x20f8   :  { %4128 = vadd.xlane.f32.xlu0 %v4127_v6  ;;  %v56_v6 = vld [vmem:[%s5813_s3 + $0x10] sm:$0xff] }
0x210e   :  { %4132 = vrot.lane.b32.xlu0 %v5540_v13, %s5220_s14 }
0x2114   :  { %v4038_v17 = vpop.f32.mrf.mxu0 }
0x2115   :  { %v4042_v60 = vadd.f32 %v4038_v17, %v3801_v40  ;;  %v4619_v17 = vld [vmem:[%s5813_s3 + $0xb] ss:$0 sm:$0xff] }
0x2116   :  { %v5012_v7 = vpop.f32.mrf.mxu0 }
0x2181   :  { %v4129_v8 = vpop.xlane.xlu0 %4128 }
0x2182   :  { %5154 = vrcp.f32 %v4129_v8 }
0x2185   :  { %v4133_v10 = vpop.permute.xlu0 %4132 }
0x2186   :  { %5019 = vmatpush3.msra.mxu0 %v4133_v10 }
0x2187   :  { %5028 = vmatprep.subr.mxu0 %v55_v33 }
0x218f   :  { %v5155_v11 = vpop.eup %5154 }
0x2190   :  { %v4131_v12 = vmul.f32 %v5155_v11, %v5153_v44  ;;  %v57_v44 = vld [vmem:[%s5813_s3 + $0x18] sm:$0xff] }
0x2192   :  { %5021 = vmatmul.mubr.msk.f32.vlgmr.msra.gmra.mxu0 %vm227_vm6, %v4131_v12 }
0x2193   :  { %5029 = vmatpush3.msra.mxu0 %v55_v33 }
0x2194   :  { %5030 = vmatprep.subr.mxu0 %v54_v36 }
0x2195   :  { %5031 = vmatpush3.msra.mxu0 %v54_v36 }
0x2196   :  { %5032 = vmatprep.subr.mxu0 %v53_v51 }
0x2197   :  { %5033 = vmatpush3.msra.mxu0 %v53_v51 }
0x2198   :  { %5034 = vmatprep.subr.mxu0 %v52_v52 }
0x2199   :  { %5035 = vmatpush3.msra.mxu0 %v52_v52 }
0x2252   :  { %v4204_v14 = vpop.f32.mrf.mxu0 }
0x2253   :  { %5026 = vmatmul.mubr.msk.f32.vlgmr.msra.gmra.mxu1 %vm227_vm6, %v4204_v14  ;;  %v4624_v14 = vld [vmem:[%s5813_s3 + $0xc] ss:$0 sm:$0xff] }
0x2254   :  { %v5022_v15 = vpop.f32.mrf.mxu0  ;;  %5040 = vmatpush3.msra.mxu1 %v63_v1 }
0x2255   :  { %5041 = vmatprep.subr.mxu1 %v62_v19 }
0x2256   :  { %5042 = vmatpush3.msra.mxu1 %v62_v19 }
0x2257   :  { %5043 = vmatprep.subr.mxu1 %v61_v53 }
0x2258   :  { %5044 = vmatpush3.msra.mxu1 %v61_v53 }
0x2259   :  { %5045 = vmatprep.subr.mxu1 %v60_v55 }
0x225a   :  { %5046 = vmatpush3.msra.mxu1 %v60_v55 }
0x225b   :  { %5047 = vmatprep.subr.mxu1 %v59_v4 }
0x225c   :  { %5048 = vmatpush3.msra.mxu1 %v59_v4 }
0x225d   :  { %5049 = vmatprep.subr.mxu1 %v58_v5 }
0x225e   :  { %5050 = vmatpush3.msra.mxu1 %v58_v5 }
0x225f   :  { %5051 = vmatprep.subr.mxu1 %v57_v44 }
0x2260   :  { %5052 = vmatpush3.msra.mxu1 %v57_v44 }
0x2261   :  { %5053 = vmatprep.subr.mxu1 %v56_v6 }
0x2262   :  { %5054 = vmatpush3.msra.mxu1 %v56_v6 }
0x2313   :  { %v4277_v18 = vpop.f32.mrf.mxu1 }
0x2314   :  { %v4281_v20 = vadd.f32 %v4277_v18, %v4042_v60 }
0x2315   :  { %v5027_v13 = vpop.f32.mrf.mxu1 }
0x2316   :  { %v4282_v22 = vadd.f32 %v4599_v57, %v4281_v20 }
0x2318   :  { %v5758_v23 = vadd.f32 %v4282_v22, %v5503_v39 }
0x231a   :  { %v4288_v24 = vsel %vm82_vm0, %v5758_v23, 0.0 }
0x231b   :  { %4289 = vadd.xlane.f32.xlu1 %v4288_v24 }
0x231f   :  { %4298 = vadd.xlane.f32.xlu1 %v4297_v0 }
0x23a4   :  { %v4290_v26 = vpop.xlane.xlu1 %4289 }
0x23a5   :  { %v4292_v28 = vmul.f32 0.03125, %v4290_v26 }
0x23a7   :  { %v4294_v29 = vsub.f32 %v5758_v23, %v4292_v28 }
0x23a8   :  { %v4299_v31 = vpop.xlane.xlu1 %4298 }
0x23a9   :  { %v4303_v32 = vmul.f32 0.032258064, %v4299_v31  ;;  %v4296_v34 = vmul.f32 %v4294_v29, %v4294_v29  ;;  %v4328_v56 = vmul.f32 %v4617_v41, %v4294_v29 }
0x23ab   :  { %5156 = vrsqrt.f32 %v4303_v32  ;;  %v4300_v35 = vsel %vm82_vm0, %v4296_v34, 0.0  ;;  %vm4307_vm15 = vcmp.eq.f32.partialorder %v4303_v32, inf  ;;  %v4310_v47 = vand.u32 2147483648, %v4303_v32 }
0x23ac   :  { %4301 = vadd.xlane.f32.xlu1 %v4300_v35  ;;  %vm4309_vm1 = vcmp.eq.f32.partialorder %v4303_v32, 0.0 }
0x23b8   :  { %v5157_v39 = vpop.eup %5156 }
0x23b9   :  { %v4306_v49 = vmul.f32 %v5157_v39, %v4303_v32 }
0x23bb   :  { %v4308_v37 = vsel %vm4307_vm15, %v4303_v32, %v4306_v49 }
0x23bc   :  { %v4311_v38 = vsel %vm4309_vm1, %v4310_v47, %v4308_v37 }
0x23bd   :  { %v4319_v40 = vadd.f32 1e-06, %v4311_v38 }
0x23bf   :  { %5158 = vrcp.f32 %v4319_v40 }
0x23cc   :  { %v5159_v43 = vpop.eup %5158 }
0x23cd   :  { %v4329_v46 = vmul.f32 %v5159_v43, %v4327_v42 }
0x23cf   :  { %v4335_v48 = vadd.f32 %v4618_v45, %v4329_v46 }
0x23d1   :  { %5036 = vmatprep.mubr.msk.f32.mxu0 %vm82_vm0, %v4335_v48 }
0x2435   :  { %v4302_v30 = vpop.xlane.xlu1 %4301 }
0x2436   :  { %v4304_v27 = vmul.f32 0.032258064, %v4302_v30 }
0x2438   :  { %5160 = vrsqrt.f32 %v4304_v27  ;;  %vm4314_vm2 = vcmp.eq.f32.partialorder %v4304_v27, inf  ;;  %v4317_v59 = vand.u32 2147483648, %v4304_v27  ;;  %vm4316_vm3 = vcmp.eq.f32.partialorder %v4304_v27, 0.0 }
0x2445   :  { %v5161_v57 = vpop.eup %5160 }
0x2446   :  { %v4313_v58 = vmul.f32 %v5161_v57, %v4304_v27 }
0x2448   :  { %v4315_v61 = vsel %vm4314_vm2, %v4304_v27, %v4313_v58 }
0x2449   :  { %v4318_v54 = vsel %vm4316_vm3, %v4317_v59, %v4315_v61 }
0x244a   :  { %v4320_v50 = vadd.f32 1e-06, %v4318_v54 }
0x244c   :  { %5162 = vrcp.f32 %v4320_v50 }
0x2459   :  { %v5163_v63 = vpop.eup %5162 }
0x245a   :  { %v4330_v2 = vmul.f32 %v5163_v63, %v4328_v56 }
0x245c   :  { %v4336_v3 = vadd.f32 %v4618_v45, %v4330_v2 }
0x245e   :  { %5037 = vmatmul.mubr.msk.f32.vlgmr.msra.gmra.mxu0 %vm82_vm0, %v4336_v3 }
0x251e   :  { %v5038_v60 = vpop.f32.mrf.mxu0 }
0x251f   :  { %v4419_v7 = vadd.f32 %v5038_v60, %v4619_v17 }
0x2520   :  { %v4413_v8 = vpop.f32.mrf.mxu0 }
0x2521   :  { %v4414_v10 = vadd.f32 %v4619_v17, %v4413_v8  ;;  %v4423_v12 = vmax.f32 %v4419_v7, 0.0 }
0x2523   :  { %v4422_v11 = vmax.f32 %v4414_v10, 0.0 }
0x2525   :  { %5055 = vmatprep.mubr.msk.f32.mxu1 %vm4424_vm4, %v4422_v11 }
0x2526   :  { %5056 = vmatmul.mubr.msk.f32.vlgmr.msra.gmra.mxu1 %vm4424_vm4, %v4423_v12 }
0x25e6   :  { %v5057_v15 = vpop.f32.mrf.mxu1 }
0x25e7   :  { %v4507_v16 = vadd.f32 %v5057_v15, %v5758_v23 }
0x25e8   :  { %v4497_v9 = vpop.f32.mrf.mxu1 }
0x25e9   :  { %v4513_v18 = vadd.f32 %v4624_v14, %v4507_v16  ;;  %v4506_v20 = vadd.f32 %v4497_v9, %v5746_v62 }
0x25eb   :  { %4515 = vst.msk [vmem:[#allocation5 + $0x8] sm:$0xff] %vm82_vm0, %v4513_v18  ;;  %v4512_v13 = vadd.f32 %v4624_v14, %v4506_v20 }
0x25ed   :  { %4514 = vst.msk [vmem:[#allocation5] sm:$0xff] %vm82_vm0, %v4512_v13 }
0x25ee   :  { %5195 = shalt.err (!%p5192_p9)
}
0x25ef   :  { %s5224_s3 = smov 128   ;;  %s5225_s1 = smov 8  }
0x25f0   :  { %4527 = dma.vmem_to_hbm [thread:$0]  %s4522_s7, 256, %s5814_s4, [#allocation4], %s5224_s3, %s5224_s3, %s5225_s1  }
0x25f1   :  { %5206 = dma.done.wait [#allocation4], 256  }
0x25f2   :  { %5207 = vsyncadd [#allocation4], 4294967040 }
0x25f3   :  { %4531 = vsyncpa [#allocation3], 1 }
0x25f4   :  { %4532 = vsyncpa [#allocation4], 1 }

</bundles_post_ra>
